<compile_context>
chip_gen: v5e
topology: v5e:2x2
jax: 0.10.0
libtpu: 0.0.40
codegen_flags: <defaults>
</compile_context>

<pallas_src>
import jax
import jax.numpy as jnp
from jax import lax
from jax.experimental import pallas as pl
from jax.experimental.pallas import tpu as pltpu  # noqa: F401  (TPU backend)

# ----------------------------- config (small) --------------------------------
VOCAB   = 100
EMB     = 32          # embedding_dim (stand-in for 768)
HEADS   = 2
DHEAD   = EMB // HEADS
FFN     = 64
NLAYERS = 2
SEQ     = 8
BATCH   = 2
TAG_TO_IX = {"O": 0, "B-LOC": 1, "I-LOC": 2, "B-ORG": 3, "I-ORG": 4}
NTAGS   = len(TAG_TO_IX)   # 5
LANE    = 128               # lane-dense padding for narrow tag dimension
NEG     = -1e30             # -inf surrogate for padded CRF lanes


# ----------------------------- shared math helpers ----------------------------
def _ln(x, g, b, eps=1e-12):
    mu = jnp.mean(x, axis=-1, keepdims=True)
    var = jnp.mean((x - mu) ** 2, axis=-1, keepdims=True)
    return (x - mu) * lax.rsqrt(var + eps) * g + b


def _gelu(x):
    c = jnp.float32(0.7978845608028654)   # sqrt(2/pi), tanh approximation (EUP)
    return 0.5 * x * (1.0 + jnp.tanh(c * (x + 0.044715 * x * x * x)))


# ----------------------------- the fused kernel -------------------------------
def _fused_bert_crf_kernel(x_ref, wqkv_ref, wo_ref, w1_ref, w2_ref, vec_ref,
                           emw_ref, trans_ref, vpad_ref, mask_ref,
                           em_ref, logz_ref):
    """Whole loss path in one kernel:
       NLAYERS fused encoder layers -> lane-padded emission projection ->
       CRF log-partition (forward algorithm), everything resident in VMEM."""
    f32, bf16 = jnp.float32, jnp.bfloat16
    BS = BATCH * SEQ
    scale = 1.0 / (DHEAD ** 0.5)

    h = x_ref[...]                                           # (BS, E) f32

    # ---- transformer encoder layers (statically unrolled over NLAYERS) ----
    for l in range(NLAYERS):
        vb   = vec_ref[l]                                    # (8, 3E) packed vectors
        bqkv = vb[0:1, :]
        bo   = vb[1:2, :EMB]
        ln1g = vb[2:3, :EMB]
        ln1b = vb[3:4, :EMB]
        b1   = vb[4:5, :FFN]
        b2   = vb[5:6, :EMB]
        ln2g = vb[6:7, :EMB]
        ln2b = vb[7:8, :EMB]

        # fused QKV projection: one MXU matmul (bf16 operands, f32 accumulate)
        qkv = jnp.dot(h.astype(bf16), wqkv_ref[l],
                      preferred_element_type=f32) + bqkv     # (BS, 3E)

        # heads folded into the batch dim: (H*B, S, Dh)
        def to_hb(t):
            return jnp.concatenate(
                [t[:, hd * DHEAD:(hd + 1) * DHEAD].reshape(BATCH, SEQ, DHEAD)
                 for hd in range(HEADS)], axis=0)
        qh = to_hb(qkv[:, 0 * EMB:1 * EMB]).astype(bf16)
        kh = to_hb(qkv[:, 1 * EMB:2 * EMB]).astype(bf16)
        vh = to_hb(qkv[:, 2 * EMB:3 * EMB]).astype(bf16)

        s = jnp.einsum("bqd,bkd->bqk", qh, kh,
                       preferred_element_type=f32) * scale   # (HB, S, S)
        s = s - jnp.max(s, axis=-1, keepdims=True)
        p = jnp.exp(s)
        p = p * pl.reciprocal(jnp.sum(p, axis=-1, keepdims=True), approx=True)
        ctx = jnp.einsum("bqk,bkd->bqd", p.astype(bf16), vh,
                         preferred_element_type=f32)         # (HB, S, Dh)

        # heads concatenated back along the lane dim -> single out-proj dot
        ctx = jnp.concatenate(
            [ctx[hd * BATCH:(hd + 1) * BATCH].reshape(BS, DHEAD)
             for hd in range(HEADS)], axis=-1)               # (BS, E)
        attn = jnp.dot(ctx.astype(bf16), wo_ref[l],
                       preferred_element_type=f32) + bo

        h1 = _ln(h + attn, ln1g, ln1b)                       # residual + LN1

        # FFN with fused bias + GELU epilogue
        ff = jnp.dot(h1.astype(bf16), w1_ref[l],
                     preferred_element_type=f32) + b1
        ff = _gelu(ff)
        ff = jnp.dot(ff.astype(bf16), w2_ref[l],
                     preferred_element_type=f32) + b2

        h = _ln(h1 + ff, ln2g, ln2b)                         # residual + LN2

    # ---- emission projection, lane-padded to LANE columns (lane-dense store) ---
    emb_bias = vpad_ref[0:1, :]                              # (1, LANE)
    em = jnp.dot(h.astype(bf16), emw_ref[...],
                 preferred_element_type=f32) + emb_bias      # (BS, LANE)
    em_ref[...] = em

    # ---- CRF log-partition; padded lanes carry -1e30 (-> exp = 0, exact) ------
    start = vpad_ref[1:2, :]                                 # (1, LANE), pads NEG
    end   = vpad_ref[2:3, :]
    trans = trans_ref[...]                                   # (LANE, LANE), pads NEG
    # stability: subtract the global transition max before exp (hoisted)
    m_tr = jnp.max(jnp.max(trans, axis=1, keepdims=True), axis=0, keepdims=True)
    trans_exp = jnp.exp(trans - m_tr)                        # <= 1, pads -> 0

    em3   = em.reshape(BATCH, SEQ, LANE)
    maskf = mask_ref[...]                                    # (B, S) f32

    # alpha'[b,j] = em_t[b,j] + logsumexp_i(alpha[b,i] + trans[i,j]),
    # computed stably as m + m_tr + log(exp(alpha-m) @ exp(trans-m_tr)).
    alpha = start + em3[:, 0, :]                             # (B, LANE)
    for t in range(1, SEQ):                                  # static unroll
        m = jnp.max(alpha, axis=-1, keepdims=True)           # (B, 1)
        srow = jnp.dot(jnp.exp(alpha - m), trans_exp,
                       preferred_element_type=jnp.float32)   # (B, LANE) MXU
        nxt = m + m_tr + jnp.log(srow) + em3[:, t, :]
        alpha = jnp.where(maskf[:, t:t + 1] > 0.0, nxt, alpha)

    final = alpha + end
    fm = jnp.max(final, axis=-1, keepdims=True)
    logz = fm + jnp.log(jnp.sum(jnp.exp(final - fm), axis=-1, keepdims=True))
    logz_ref[...] = jnp.broadcast_to(logz, logz_ref.shape)   # lane-dense store


def fused_forward(packed, x0, maskf):
    """Single pallas_call for the whole loss path.  Returns (em_pad, logz_pad)."""
    return pl.pallas_call(
        _fused_bert_crf_kernel,
        out_shape=(jax.ShapeDtypeStruct((BATCH * SEQ, LANE), jnp.float32),
                   jax.ShapeDtypeStruct((BATCH, LANE), jnp.float32)),
    )(x0, packed["wqkv"], packed["wo"], packed["w1"], packed["w2"],
      packed["vec"], packed["emw"], packed["trans"], packed["vpad"], maskf)


# ----------------------------- operand packing (hoisted) ----------------------
def pack_params(params):
    """Build kernel operands ONCE (not per forward step): stacked bf16 weight
    matrices, one packed (8, 3E) bias/LN slab per layer, lane-padded emission
    weights and CRF parameters."""
    layers = params["layers"]
    packed = {
        "wqkv": jnp.stack([l["wqkv"] for l in layers]).astype(jnp.bfloat16),
        "wo":   jnp.stack([l["wo"]   for l in layers]).astype(jnp.bfloat16),
        "w1":   jnp.stack([l["w1"]   for l in layers]).astype(jnp.bfloat16),
        "w2":   jnp.stack([l["w2"]   for l in layers]).astype(jnp.bfloat16),
    }
    vec = jnp.zeros((NLAYERS, 8, 3 * EMB), jnp.float32)
    for i, l in enumerate(layers):
        vec = (vec.at[i, 0, :3 * EMB].set(l["bqkv"])
                  .at[i, 1, :EMB].set(l["bo"])
                  .at[i, 2, :EMB].set(l["ln1_g"])
                  .at[i, 3, :EMB].set(l["ln1_b"])
                  .at[i, 4, :FFN].set(l["b1"])
                  .at[i, 5, :EMB].set(l["b2"])
                  .at[i, 6, :EMB].set(l["ln2_g"])
                  .at[i, 7, :EMB].set(l["ln2_b"]))
    packed["vec"] = vec
    packed["emw"] = (jnp.zeros((EMB, LANE), jnp.float32)
                     .at[:, :NTAGS].set(params["lin_w"]).astype(jnp.bfloat16))
    packed["trans"] = (jnp.full((LANE, LANE), NEG, jnp.float32)
                       .at[:NTAGS, :NTAGS].set(params["crf_trans"]))
    vpad = jnp.full((4, LANE), NEG, jnp.float32)
    vpad = vpad.at[0, :].set(0.0).at[0, :NTAGS].set(params["lin_b"])  # emission bias
    vpad = vpad.at[1, :NTAGS].set(params["crf_start"])                 # CRF start
    vpad = vpad.at[2, :NTAGS].set(params["crf_end"])                   # CRF end
    vpad = vpad.at[3, :].set(0.0)                                      # spare row
    packed["vpad"] = vpad
    return packed


# ----------------------------- JAX-side pieces --------------------------------
def embed(params, sentence):
    """Embedding gather + embedding LayerNorm (cheap gathers; stays in JAX)."""
    B, S = sentence.shape
    x = params["word_emb"][sentence] + params["pos_emb"][None, :S, :]
    mu = jnp.mean(x, -1, keepdims=True)
    var = jnp.mean((x - mu) ** 2, -1, keepdims=True)
    x = (x - mu) * lax.rsqrt(var + 1e-12) * params["ln_emb_g"] + params["ln_emb_b"]
    return x.reshape(B * S, EMB).astype(jnp.float32)


def get_features_and_logz(params, packed, sentence, mask):
    x0 = embed(params, sentence)
    # self.dropout(p=0.1): identity (eval-mode / deterministic semantics)
    em_pad, logz_pad = fused_forward(packed, x0, mask.astype(jnp.float32))
    emissions = em_pad[:, :NTAGS].reshape(BATCH, SEQ, NTAGS)
    return emissions, logz_pad[:, 0]


def crf_gold_score(emissions, tags, mask, trans, start, end):
    """Gold-path score — pure gathers, cheaper as XLA ops than in-kernel
    one-hot reductions.  Requires mask[:,0]==1 and prefix-contiguous masks."""
    B, S, T = emissions.shape
    ar = jnp.arange(B)
    maskf = mask.astype(jnp.float32)
    score = start[tags[:, 0]] + emissions[ar, 0, tags[:, 0]]
    prev, cur = tags[:, :-1], tags[:, 1:]
    trans_sc = trans[prev, cur]                                        # (B, S-1)
    em_sc = jnp.take_along_axis(emissions[:, 1:, :],
                                cur[..., None], axis=-1)[..., 0]       # (B, S-1)
    score = score + jnp.sum((trans_sc + em_sc) * maskf[:, 1:], axis=1)
    last_idx = jnp.sum(mask.astype(jnp.int32), axis=1) - 1
    score = score + end[tags[ar, last_idx]]
    return score


def bert_crf_forward(params, packed, sentence, tags, mask, is_test=False):
    emissions, logz = get_features_and_logz(params, packed, sentence, mask)
    if not is_test:
        gold = crf_gold_score(emissions, tags, mask, params["crf_trans"],
                              params["crf_start"], params["crf_end"])
        return jnp.mean(logz - gold)                         # loss.mean()
    # TODO(synk): viterbi_decode path (is_test=True) not implemented.
    raise NotImplementedError("viterbi_decode (is_test=True) not implemented")


# ----------------------------- params ------------------------------------------
def init_params(key):
    keys = iter(jax.random.split(key, 128))

    def nrm(shape, scale=0.05):
        return scale * jax.random.normal(next(keys), shape, dtype=jnp.float32)

    params = {
        "word_emb": nrm((VOCAB, EMB)),
        "pos_emb": nrm((SEQ, EMB)),
        "ln_emb_g": jnp.ones((EMB,), jnp.float32),
        "ln_emb_b": jnp.zeros((EMB,), jnp.float32),
        "layers": [],
        "lin_w": nrm((EMB, NTAGS)),
        "lin_b": jnp.zeros((NTAGS,), jnp.float32),
        "crf_trans": nrm((NTAGS, NTAGS), 0.1),
        "crf_start": nrm((NTAGS,), 0.1),
        "crf_end": nrm((NTAGS,), 0.1),
    }
    for _ in range(NLAYERS):
        params["layers"].append({
            "wqkv": nrm((EMB, 3 * EMB)),
            "bqkv": jnp.zeros((3 * EMB,), jnp.float32),
            "wo": nrm((EMB, EMB)), "bo": jnp.zeros((EMB,), jnp.float32),
            "ln1_g": jnp.ones((EMB,), jnp.float32),
            "ln1_b": jnp.zeros((EMB,), jnp.float32),
            "w1": nrm((EMB, FFN)), "b1": jnp.zeros((FFN,), jnp.float32),
            "w2": nrm((FFN, EMB)), "b2": jnp.zeros((EMB,), jnp.float32),
            "ln2_g": jnp.ones((EMB,), jnp.float32),
            "ln2_b": jnp.zeros((EMB,), jnp.float32),
        })
    return params


# ----------------------------- pure-JAX references -----------------------------
def encoder_ref(params, sentence):
    """Pure-JAX mirror of the in-kernel encoder (same bf16-operand / f32-acc
    matmul structure) used only for correctness checks."""
    bf16, f32 = jnp.bfloat16, jnp.float32
    B, S = sentence.shape
    x = embed(params, sentence)
    scale = 1.0 / (DHEAD ** 0.5)
    for l in params["layers"]:
        qkv = jnp.dot(x.astype(bf16), l["wqkv"].astype(bf16),
                      preferred_element_type=f32) + l["bqkv"]
        q = qkv[:, :EMB].reshape(B, S, HEADS, DHEAD).transpose(0, 2, 1, 3)
        k = qkv[:, EMB:2 * EMB].reshape(B, S, HEADS, DHEAD).transpose(0, 2, 1, 3)
        v = qkv[:, 2 * EMB:].reshape(B, S, HEADS, DHEAD).transpose(0, 2, 1, 3)
        s = jnp.einsum("bhqd,bhkd->bhqk", q.astype(bf16), k.astype(bf16),
                       preferred_element_type=f32) * scale
        p = jax.nn.softmax(s, axis=-1)
        ctx = jnp.einsum("bhqk,bhkd->bhqd", p.astype(bf16), v.astype(bf16),
                         preferred_element_type=f32)
        ctx = ctx.transpose(0, 2, 1, 3).reshape(B * S, EMB)
        attn = jnp.dot(ctx.astype(bf16), l["wo"].astype(bf16),
                       preferred_element_type=f32) + l["bo"]
        h1 = _ln(x + attn, l["ln1_g"], l["ln1_b"])
        ff = jnp.dot(h1.astype(bf16), l["w1"].astype(bf16),
                     preferred_element_type=f32) + l["b1"]
        ff = _gelu(ff)
        ff = jnp.dot(ff.astype(bf16), l["w2"].astype(bf16),
                     preferred_element_type=f32) + l["b2"]
        x = _ln(h1 + ff, l["ln2_g"], l["ln2_b"])
    return x


def _logsumexp(x, axis):
    m = jnp.max(x, axis=axis, keepdims=True)
    return jnp.squeeze(m, axis) + jnp.log(jnp.sum(jnp.exp(x - m), axis=axis))


def crf_nll_ref(emissions, tags, mask, trans, start, end):
    """Pure-JAX reference for the CRF negative log-likelihood."""
    B, S, T = emissions.shape
    maskf = mask.astype(jnp.float32)
    ar = jnp.arange(B)
    score = start[tags[:, 0]] + emissions[ar, 0, tags[:, 0]]
    for t in range(1, S):
        inc = trans[tags[:, t - 1], tags[:, t]] + emissions[ar, t, tags[:, t]]
        score = score + inc * maskf[:, t]
    last_idx = jnp.sum(mask, axis=1) - 1
    score = score + end[tags[ar, last_idx]]

    alpha = start[None, :] + emissions[:, 0]
    for t in range(1, S):
        brd = alpha[:, :, None] + trans[None] + emissions[:, t][:, None, :]
        nxt = _logsumexp(brd, axis=1)
        alpha = jnp.where(maskf[:, t][:, None] > 0, nxt, alpha)
    logz = _logsumexp(alpha + end[None, :], axis=1)
    return logz - score


# ----------------------------- main --------------------------------------------
if __name__ == "__main__":
    key = jax.random.PRNGKey(0)
    kp, ks, kt = jax.random.split(key, 3)
    params = init_params(kp)
    packed = pack_params(params)          # padded / stacked operands built once

    sentence = jax.random.randint(ks, (BATCH, SEQ), 0, VOCAB, dtype=jnp.int32)
    tags = jax.random.randint(kt, (BATCH, SEQ), 0, NTAGS, dtype=jnp.int32)
    lengths = jnp.array([SEQ, 5], dtype=jnp.int32)
    mask = (jnp.arange(SEQ)[None, :] < lengths[:, None]).astype(jnp.int32)

    # torchcrf-style requirement: first timestep valid, prefix-contiguous mask
    assert bool(jnp.all(mask[:, 0] == 1))

    # full forward (loss path): ONE fused pallas_call + JAX gathers
    loss = bert_crf_forward(params, packed, sentence, tags, mask, is_test=False)
    loss = jax.block_until_ready(loss)

    # correctness checks against pure-JAX references
    emissions, logz = get_features_and_logz(params, packed, sentence, mask)
    enc_ref = encoder_ref(params, sentence)
    ref_em = (jnp.dot(enc_ref.astype(jnp.bfloat16),
                      params["lin_w"].astype(jnp.bfloat16),
                      preferred_element_type=jnp.float32) + params["lin_b"])
    assert bool(jnp.allclose(emissions.reshape(-1, NTAGS), ref_em,
                             atol=5e-3, rtol=5e-3))

    nll_k = logz - crf_gold_score(emissions, tags, mask, params["crf_trans"],
                                  params["crf_start"], params["crf_end"])
    nll_r = crf_nll_ref(emissions, tags, mask, params["crf_trans"],
                        params["crf_start"], params["crf_end"])
    assert bool(jnp.allclose(nll_k, nll_r, atol=1e-3, rtol=1e-3))
    assert bool(jnp.isfinite(loss))
    assert bool(jnp.allclose(loss, jnp.mean(nll_r), atol=1e-3, rtol=1e-3))

    print("KERNEL_OK")
</pallas_src>

<mosaic_0001>
module attributes {stable_mosaic.version = 11 : i64} {
  func.func @_fused_bert_crf_kernel(%arg0: memref<16x32xf32, #tpu.memory_space<vmem>>, %arg1: memref<2x32x96xbf16, #tpu.memory_space<vmem>>, %arg2: memref<2x32x32xbf16, #tpu.memory_space<vmem>>, %arg3: memref<2x32x64xbf16, #tpu.memory_space<vmem>>, %arg4: memref<2x64x32xbf16, #tpu.memory_space<vmem>>, %arg5: memref<2x8x96xf32, #tpu.memory_space<vmem>>, %arg6: memref<32x128xbf16, #tpu.memory_space<vmem>>, %arg7: memref<128x128xf32, #tpu.memory_space<vmem>>, %arg8: memref<4x128xf32, #tpu.memory_space<vmem>>, %arg9: memref<2x8xf32, #tpu.memory_space<vmem>>, %arg10: memref<16x128xf32, #tpu.memory_space<vmem>>, %arg11: memref<2x128xf32, #tpu.memory_space<vmem>>) attributes {dimension_semantics = [], scalar_prefetch = 0 : i64, scratch_operands = 0 : i64, tpu.core_type = #tpu.core_type<tc>} {
    %c0 = arith.constant 0 : index
    %c0_0 = arith.constant 0 : index
    %0 = vector.load %arg0[%c0, %c0_0] : memref<16x32xf32, #tpu.memory_space<vmem>>, vector<16x32xf32>
    %c0_1 = arith.constant 0 : index
    %c0_2 = arith.constant 0 : index
    %c0_3 = arith.constant 0 : index
    %1 = vector.load %arg5[%c0_1, %c0_2, %c0_3] : memref<2x8x96xf32, #tpu.memory_space<vmem>>, vector<1x8x96xf32>
    %2 = vector.shape_cast %1 : vector<1x8x96xf32> to vector<8x96xf32>
    %3 = vector.extract_strided_slice %2 {offsets = [0, 0], sizes = [1, 96], strides = [1, 1]} : vector<8x96xf32> to vector<1x96xf32>
    %4 = vector.extract_strided_slice %2 {offsets = [1, 0], sizes = [1, 32], strides = [1, 1]} : vector<8x96xf32> to vector<1x32xf32>
    %5 = vector.extract_strided_slice %2 {offsets = [2, 0], sizes = [1, 32], strides = [1, 1]} : vector<8x96xf32> to vector<1x32xf32>
    %6 = vector.extract_strided_slice %2 {offsets = [3, 0], sizes = [1, 32], strides = [1, 1]} : vector<8x96xf32> to vector<1x32xf32>
    %7 = vector.extract_strided_slice %2 {offsets = [4, 0], sizes = [1, 64], strides = [1, 1]} : vector<8x96xf32> to vector<1x64xf32>
    %8 = vector.extract_strided_slice %2 {offsets = [5, 0], sizes = [1, 32], strides = [1, 1]} : vector<8x96xf32> to vector<1x32xf32>
    %9 = vector.extract_strided_slice %2 {offsets = [6, 0], sizes = [1, 32], strides = [1, 1]} : vector<8x96xf32> to vector<1x32xf32>
    %10 = vector.extract_strided_slice %2 {offsets = [7, 0], sizes = [1, 32], strides = [1, 1]} : vector<8x96xf32> to vector<1x32xf32>
    %11 = arith.truncf %0 : vector<16x32xf32> to vector<16x32xbf16>
    %c0_4 = arith.constant 0 : index
    %c0_5 = arith.constant 0 : index
    %c0_6 = arith.constant 0 : index
    %12 = vector.load %arg1[%c0_4, %c0_5, %c0_6] : memref<2x32x96xbf16, #tpu.memory_space<vmem>>, vector<1x32x96xbf16>
    %13 = vector.shape_cast %12 : vector<1x32x96xbf16> to vector<32x96xbf16>
    %cst = arith.constant dense<0.000000e+00> : vector<16x96xf32>
    %14 = tpu.matmul %11, %13, %cst {dimension_numbers = #tpu.dot_dimension_numbers<[1], [0], [0], [1], [0, 0, 1, 1], [], []>} : vector<16x32xbf16>, vector<32x96xbf16>, vector<16x96xf32> -> vector<16x96xf32>
    %15 = vector.broadcast %3 : vector<1x96xf32> to vector<16x96xf32>
    %16 = arith.addf %14, %15 : vector<16x96xf32>
    %17 = vector.extract_strided_slice %16 {offsets = [0, 0], sizes = [16, 32], strides = [1, 1]} : vector<16x96xf32> to vector<16x32xf32>
    %18 = vector.extract_strided_slice %17 {offsets = [0, 0], sizes = [16, 16], strides = [1, 1]} : vector<16x32xf32> to vector<16x16xf32>
    %19 = vector.shape_cast %18 : vector<16x16xf32> to vector<2x8x16xf32>
    %20 = vector.extract_strided_slice %17 {offsets = [0, 16], sizes = [16, 16], strides = [1, 1]} : vector<16x32xf32> to vector<16x16xf32>
    %21 = vector.shape_cast %20 : vector<16x16xf32> to vector<2x8x16xf32>
    %22 = tpu.concatenate %19, %21 in 0 : vector<2x8x16xf32>, vector<2x8x16xf32> -> vector<4x8x16xf32>
    %23 = arith.truncf %22 : vector<4x8x16xf32> to vector<4x8x16xbf16>
    %24 = vector.extract_strided_slice %16 {offsets = [0, 32], sizes = [16, 32], strides = [1, 1]} : vector<16x96xf32> to vector<16x32xf32>
    %25 = vector.extract_strided_slice %24 {offsets = [0, 0], sizes = [16, 16], strides = [1, 1]} : vector<16x32xf32> to vector<16x16xf32>
    %26 = vector.shape_cast %25 : vector<16x16xf32> to vector<2x8x16xf32>
    %27 = vector.extract_strided_slice %24 {offsets = [0, 16], sizes = [16, 16], strides = [1, 1]} : vector<16x32xf32> to vector<16x16xf32>
    %28 = vector.shape_cast %27 : vector<16x16xf32> to vector<2x8x16xf32>
    %29 = tpu.concatenate %26, %28 in 0 : vector<2x8x16xf32>, vector<2x8x16xf32> -> vector<4x8x16xf32>
    %30 = arith.truncf %29 : vector<4x8x16xf32> to vector<4x8x16xbf16>
    %31 = vector.extract_strided_slice %16 {offsets = [0, 64], sizes = [16, 32], strides = [1, 1]} : vector<16x96xf32> to vector<16x32xf32>
    %32 = vector.extract_strided_slice %31 {offsets = [0, 0], sizes = [16, 16], strides = [1, 1]} : vector<16x32xf32> to vector<16x16xf32>
    %33 = vector.shape_cast %32 : vector<16x16xf32> to vector<2x8x16xf32>
    %34 = vector.extract_strided_slice %31 {offsets = [0, 16], sizes = [16, 16], strides = [1, 1]} : vector<16x32xf32> to vector<16x16xf32>
    %35 = vector.shape_cast %34 : vector<16x16xf32> to vector<2x8x16xf32>
    %36 = tpu.concatenate %33, %35 in 0 : vector<2x8x16xf32>, vector<2x8x16xf32> -> vector<4x8x16xf32>
    %37 = arith.truncf %36 : vector<4x8x16xf32> to vector<4x8x16xbf16>
    "tpu.trace_start"() <{level = 10 : i32, message = "bqd,bkd->bqk"}> : () -> ()
    %cst_7 = arith.constant dense<0.000000e+00> : vector<4x8x8xf32>
    %38 = tpu.matmul %23, %30, %cst_7 {dimension_numbers = #tpu.dot_dimension_numbers<[2], [2], [1], [1], [0, 0, 0, 1, 1, 1], [0], [0]>} : vector<4x8x16xbf16>, vector<4x8x16xbf16>, vector<4x8x8xf32> -> vector<4x8x8xf32>
    "tpu.trace_stop"() : () -> ()
    %cst_8 = arith.constant 2.500000e-01 : f32
    %39 = vector.broadcast %cst_8 : f32 to vector<4x8x8xf32>
    %40 = arith.mulf %38, %39 : vector<4x8x8xf32>
    %cst_9 = arith.constant dense<0xFF800000> : vector<4x8xf32>
    %41 = vector.multi_reduction <maximumf>, %40, %cst_9 [2] : vector<4x8x8xf32> to vector<4x8xf32>
    %42 = vector.shape_cast %41 : vector<4x8xf32> to vector<4x8x1xf32>
    %43 = vector.broadcast %42 : vector<4x8x1xf32> to vector<4x8x8xf32>
    %44 = arith.subf %40, %43 : vector<4x8x8xf32>
    %45 = math.exp %44 : vector<4x8x8xf32>
    %cst_10 = arith.constant dense<0.000000e+00> : vector<4x8xf32>
    %46 = vector.multi_reduction <add>, %45, %cst_10 [2] : vector<4x8x8xf32> to vector<4x8xf32>
    %47 = vector.shape_cast %46 : vector<4x8xf32> to vector<4x8x1xf32>
    %48 = tpu.reciprocal %47 {approx = true} : vector<4x8x1xf32> -> vector<4x8x1xf32>
    %49 = vector.broadcast %48 : vector<4x8x1xf32> to vector<4x8x8xf32>
    %50 = arith.mulf %45, %49 : vector<4x8x8xf32>
    %51 = arith.truncf %50 : vector<4x8x8xf32> to vector<4x8x8xbf16>
    "tpu.trace_start"() <{level = 10 : i32, message = "bqk,bkd->bqd"}> : () -> ()
    %cst_11 = arith.constant dense<0.000000e+00> : vector<4x8x16xf32>
    %52 = tpu.matmul %51, %37, %cst_11 {dimension_numbers = #tpu.dot_dimension_numbers<[2], [1], [1], [2], [0, 0, 0, 1, 1, 2], [0], [0]>} : vector<4x8x8xbf16>, vector<4x8x16xbf16>, vector<4x8x16xf32> -> vector<4x8x16xf32>
    "tpu.trace_stop"() : () -> ()
    %53 = vector.extract_strided_slice %52 {offsets = [0, 0, 0], sizes = [2, 8, 16], strides = [1, 1, 1]} : vector<4x8x16xf32> to vector<2x8x16xf32>
    %54 = vector.shape_cast %53 : vector<2x8x16xf32> to vector<16x16xf32>
    %55 = vector.extract_strided_slice %52 {offsets = [2, 0, 0], sizes = [2, 8, 16], strides = [1, 1, 1]} : vector<4x8x16xf32> to vector<2x8x16xf32>
    %56 = vector.shape_cast %55 : vector<2x8x16xf32> to vector<16x16xf32>
    %57 = tpu.concatenate %54, %56 in 1 : vector<16x16xf32>, vector<16x16xf32> -> vector<16x32xf32>
    %58 = arith.truncf %57 : vector<16x32xf32> to vector<16x32xbf16>
    %c0_12 = arith.constant 0 : index
    %c0_13 = arith.constant 0 : index
    %c0_14 = arith.constant 0 : index
    %59 = vector.load %arg2[%c0_12, %c0_13, %c0_14] : memref<2x32x32xbf16, #tpu.memory_space<vmem>>, vector<1x32x32xbf16>
    %60 = vector.shape_cast %59 : vector<1x32x32xbf16> to vector<32x32xbf16>
    %cst_15 = arith.constant dense<0.000000e+00> : vector<16x32xf32>
    %61 = tpu.matmul %58, %60, %cst_15 {dimension_numbers = #tpu.dot_dimension_numbers<[1], [0], [0], [1], [0, 0, 1, 1], [], []>} : vector<16x32xbf16>, vector<32x32xbf16>, vector<16x32xf32> -> vector<16x32xf32>
    %62 = vector.broadcast %4 : vector<1x32xf32> to vector<16x32xf32>
    %63 = arith.addf %61, %62 : vector<16x32xf32>
    %64 = arith.addf %0, %63 : vector<16x32xf32>
    %cst_16 = arith.constant dense<0.000000e+00> : vector<16xf32>
    %65 = vector.multi_reduction <add>, %64, %cst_16 [1] : vector<16x32xf32> to vector<16xf32>
    %66 = vector.shape_cast %65 : vector<16xf32> to vector<16x1xf32>
    %cst_17 = arith.constant 3.200000e+01 : f32
    %67 = vector.broadcast %cst_17 : f32 to vector<16x1xf32>
    %68 = arith.divf %66, %67 : vector<16x1xf32>
    %69 = vector.broadcast %68 : vector<16x1xf32> to vector<16x32xf32>
    %70 = arith.subf %64, %69 : vector<16x32xf32>
    %71 = arith.mulf %70, %70 : vector<16x32xf32>
    %cst_18 = arith.constant dense<0.000000e+00> : vector<16xf32>
    %72 = vector.multi_reduction <add>, %71, %cst_18 [1] : vector<16x32xf32> to vector<16xf32>
    %73 = vector.shape_cast %72 : vector<16xf32> to vector<16x1xf32>
    %cst_19 = arith.constant 3.200000e+01 : f32
    %74 = vector.broadcast %cst_19 : f32 to vector<16x1xf32>
    %75 = arith.divf %73, %74 : vector<16x1xf32>
    %76 = vector.broadcast %68 : vector<16x1xf32> to vector<16x32xf32>
    %77 = arith.subf %64, %76 : vector<16x32xf32>
    %cst_20 = arith.constant 9.99999996E-13 : f32
    %78 = vector.broadcast %cst_20 : f32 to vector<16x1xf32>
    %79 = arith.addf %75, %78 : vector<16x1xf32>
    %80 = math.rsqrt %79 : vector<16x1xf32>
    %81 = vector.broadcast %80 : vector<16x1xf32> to vector<16x32xf32>
    %82 = arith.mulf %77, %81 : vector<16x32xf32>
    %83 = vector.broadcast %5 : vector<1x32xf32> to vector<16x32xf32>
    %84 = arith.mulf %82, %83 : vector<16x32xf32>
    %85 = vector.broadcast %6 : vector<1x32xf32> to vector<16x32xf32>
    %86 = arith.addf %84, %85 : vector<16x32xf32>
    %87 = arith.truncf %86 : vector<16x32xf32> to vector<16x32xbf16>
    %c0_21 = arith.constant 0 : index
    %c0_22 = arith.constant 0 : index
    %c0_23 = arith.constant 0 : index
    %88 = vector.load %arg3[%c0_21, %c0_22, %c0_23] : memref<2x32x64xbf16, #tpu.memory_space<vmem>>, vector<1x32x64xbf16>
    %89 = vector.shape_cast %88 : vector<1x32x64xbf16> to vector<32x64xbf16>
    %cst_24 = arith.constant dense<0.000000e+00> : vector<16x64xf32>
    %90 = tpu.matmul %87, %89, %cst_24 {dimension_numbers = #tpu.dot_dimension_numbers<[1], [0], [0], [1], [0, 0, 1, 1], [], []>} : vector<16x32xbf16>, vector<32x64xbf16>, vector<16x64xf32> -> vector<16x64xf32>
    %91 = vector.broadcast %7 : vector<1x64xf32> to vector<16x64xf32>
    %92 = arith.addf %90, %91 : vector<16x64xf32>
    %cst_25 = arith.constant 5.000000e-01 : f32
    %93 = vector.broadcast %cst_25 : f32 to vector<16x64xf32>
    %94 = arith.mulf %93, %92 : vector<16x64xf32>
    %cst_26 = arith.constant 4.471500e-02 : f32
    %95 = vector.broadcast %cst_26 : f32 to vector<16x64xf32>
    %96 = arith.mulf %95, %92 : vector<16x64xf32>
    %97 = arith.mulf %96, %92 : vector<16x64xf32>
    %98 = arith.mulf %97, %92 : vector<16x64xf32>
    %99 = arith.addf %92, %98 : vector<16x64xf32>
    %cst_27 = arith.constant 0.797884583 : f32
    %100 = vector.broadcast %cst_27 : f32 to vector<16x64xf32>
    %101 = arith.mulf %100, %99 : vector<16x64xf32>
    %102 = math.tanh %101 : vector<16x64xf32>
    %cst_28 = arith.constant 1.000000e+00 : f32
    %103 = vector.broadcast %cst_28 : f32 to vector<16x64xf32>
    %104 = arith.addf %103, %102 : vector<16x64xf32>
    %105 = arith.mulf %94, %104 : vector<16x64xf32>
    %106 = arith.truncf %105 : vector<16x64xf32> to vector<16x64xbf16>
    %c0_29 = arith.constant 0 : index
    %c0_30 = arith.constant 0 : index
    %c0_31 = arith.constant 0 : index
    %107 = vector.load %arg4[%c0_29, %c0_30, %c0_31] : memref<2x64x32xbf16, #tpu.memory_space<vmem>>, vector<1x64x32xbf16>
    %108 = vector.shape_cast %107 : vector<1x64x32xbf16> to vector<64x32xbf16>
    %cst_32 = arith.constant dense<0.000000e+00> : vector<16x32xf32>
    %109 = tpu.matmul %106, %108, %cst_32 {dimension_numbers = #tpu.dot_dimension_numbers<[1], [0], [0], [1], [0, 0, 1, 1], [], []>} : vector<16x64xbf16>, vector<64x32xbf16>, vector<16x32xf32> -> vector<16x32xf32>
    %110 = vector.broadcast %8 : vector<1x32xf32> to vector<16x32xf32>
    %111 = arith.addf %109, %110 : vector<16x32xf32>
    %112 = arith.addf %86, %111 : vector<16x32xf32>
    %cst_33 = arith.constant dense<0.000000e+00> : vector<16xf32>
    %113 = vector.multi_reduction <add>, %112, %cst_33 [1] : vector<16x32xf32> to vector<16xf32>
    %114 = vector.shape_cast %113 : vector<16xf32> to vector<16x1xf32>
    %cst_34 = arith.constant 3.200000e+01 : f32
    %115 = vector.broadcast %cst_34 : f32 to vector<16x1xf32>
    %116 = arith.divf %114, %115 : vector<16x1xf32>
    %117 = vector.broadcast %116 : vector<16x1xf32> to vector<16x32xf32>
    %118 = arith.subf %112, %117 : vector<16x32xf32>
    %119 = arith.mulf %118, %118 : vector<16x32xf32>
    %cst_35 = arith.constant dense<0.000000e+00> : vector<16xf32>
    %120 = vector.multi_reduction <add>, %119, %cst_35 [1] : vector<16x32xf32> to vector<16xf32>
    %121 = vector.shape_cast %120 : vector<16xf32> to vector<16x1xf32>
    %cst_36 = arith.constant 3.200000e+01 : f32
    %122 = vector.broadcast %cst_36 : f32 to vector<16x1xf32>
    %123 = arith.divf %121, %122 : vector<16x1xf32>
    %124 = vector.broadcast %116 : vector<16x1xf32> to vector<16x32xf32>
    %125 = arith.subf %112, %124 : vector<16x32xf32>
    %cst_37 = arith.constant 9.99999996E-13 : f32
    %126 = vector.broadcast %cst_37 : f32 to vector<16x1xf32>
    %127 = arith.addf %123, %126 : vector<16x1xf32>
    %128 = math.rsqrt %127 : vector<16x1xf32>
    %129 = vector.broadcast %128 : vector<16x1xf32> to vector<16x32xf32>
    %130 = arith.mulf %125, %129 : vector<16x32xf32>
    %131 = vector.broadcast %9 : vector<1x32xf32> to vector<16x32xf32>
    %132 = arith.mulf %130, %131 : vector<16x32xf32>
    %133 = vector.broadcast %10 : vector<1x32xf32> to vector<16x32xf32>
    %134 = arith.addf %132, %133 : vector<16x32xf32>
    %c1 = arith.constant 1 : index
    %c0_38 = arith.constant 0 : index
    %c0_39 = arith.constant 0 : index
    %135 = vector.load %arg5[%c1, %c0_38, %c0_39] : memref<2x8x96xf32, #tpu.memory_space<vmem>>, vector<1x8x96xf32>
    %136 = vector.shape_cast %135 : vector<1x8x96xf32> to vector<8x96xf32>
    %137 = vector.extract_strided_slice %136 {offsets = [0, 0], sizes = [1, 96], strides = [1, 1]} : vector<8x96xf32> to vector<1x96xf32>
    %138 = vector.extract_strided_slice %136 {offsets = [1, 0], sizes = [1, 32], strides = [1, 1]} : vector<8x96xf32> to vector<1x32xf32>
    %139 = vector.extract_strided_slice %136 {offsets = [2, 0], sizes = [1, 32], strides = [1, 1]} : vector<8x96xf32> to vector<1x32xf32>
    %140 = vector.extract_strided_slice %136 {offsets = [3, 0], sizes = [1, 32], strides = [1, 1]} : vector<8x96xf32> to vector<1x32xf32>
    %141 = vector.extract_strided_slice %136 {offsets = [4, 0], sizes = [1, 64], strides = [1, 1]} : vector<8x96xf32> to vector<1x64xf32>
    %142 = vector.extract_strided_slice %136 {offsets = [5, 0], sizes = [1, 32], strides = [1, 1]} : vector<8x96xf32> to vector<1x32xf32>
    %143 = vector.extract_strided_slice %136 {offsets = [6, 0], sizes = [1, 32], strides = [1, 1]} : vector<8x96xf32> to vector<1x32xf32>
    %144 = vector.extract_strided_slice %136 {offsets = [7, 0], sizes = [1, 32], strides = [1, 1]} : vector<8x96xf32> to vector<1x32xf32>
    %145 = arith.truncf %134 : vector<16x32xf32> to vector<16x32xbf16>
    %c1_40 = arith.constant 1 : index
    %c0_41 = arith.constant 0 : index
    %c0_42 = arith.constant 0 : index
    %146 = vector.load %arg1[%c1_40, %c0_41, %c0_42] : memref<2x32x96xbf16, #tpu.memory_space<vmem>>, vector<1x32x96xbf16>
    %147 = vector.shape_cast %146 : vector<1x32x96xbf16> to vector<32x96xbf16>
    %cst_43 = arith.constant dense<0.000000e+00> : vector<16x96xf32>
    %148 = tpu.matmul %145, %147, %cst_43 {dimension_numbers = #tpu.dot_dimension_numbers<[1], [0], [0], [1], [0, 0, 1, 1], [], []>} : vector<16x32xbf16>, vector<32x96xbf16>, vector<16x96xf32> -> vector<16x96xf32>
    %149 = vector.broadcast %137 : vector<1x96xf32> to vector<16x96xf32>
    %150 = arith.addf %148, %149 : vector<16x96xf32>
    %151 = vector.extract_strided_slice %150 {offsets = [0, 0], sizes = [16, 32], strides = [1, 1]} : vector<16x96xf32> to vector<16x32xf32>
    %152 = vector.extract_strided_slice %151 {offsets = [0, 0], sizes = [16, 16], strides = [1, 1]} : vector<16x32xf32> to vector<16x16xf32>
    %153 = vector.shape_cast %152 : vector<16x16xf32> to vector<2x8x16xf32>
    %154 = vector.extract_strided_slice %151 {offsets = [0, 16], sizes = [16, 16], strides = [1, 1]} : vector<16x32xf32> to vector<16x16xf32>
    %155 = vector.shape_cast %154 : vector<16x16xf32> to vector<2x8x16xf32>
    %156 = tpu.concatenate %153, %155 in 0 : vector<2x8x16xf32>, vector<2x8x16xf32> -> vector<4x8x16xf32>
    %157 = arith.truncf %156 : vector<4x8x16xf32> to vector<4x8x16xbf16>
    %158 = vector.extract_strided_slice %150 {offsets = [0, 32], sizes = [16, 32], strides = [1, 1]} : vector<16x96xf32> to vector<16x32xf32>
    %159 = vector.extract_strided_slice %158 {offsets = [0, 0], sizes = [16, 16], strides = [1, 1]} : vector<16x32xf32> to vector<16x16xf32>
    %160 = vector.shape_cast %159 : vector<16x16xf32> to vector<2x8x16xf32>
    %161 = vector.extract_strided_slice %158 {offsets = [0, 16], sizes = [16, 16], strides = [1, 1]} : vector<16x32xf32> to vector<16x16xf32>
    %162 = vector.shape_cast %161 : vector<16x16xf32> to vector<2x8x16xf32>
    %163 = tpu.concatenate %160, %162 in 0 : vector<2x8x16xf32>, vector<2x8x16xf32> -> vector<4x8x16xf32>
    %164 = arith.truncf %163 : vector<4x8x16xf32> to vector<4x8x16xbf16>
    %165 = vector.extract_strided_slice %150 {offsets = [0, 64], sizes = [16, 32], strides = [1, 1]} : vector<16x96xf32> to vector<16x32xf32>
    %166 = vector.extract_strided_slice %165 {offsets = [0, 0], sizes = [16, 16], strides = [1, 1]} : vector<16x32xf32> to vector<16x16xf32>
    %167 = vector.shape_cast %166 : vector<16x16xf32> to vector<2x8x16xf32>
    %168 = vector.extract_strided_slice %165 {offsets = [0, 16], sizes = [16, 16], strides = [1, 1]} : vector<16x32xf32> to vector<16x16xf32>
    %169 = vector.shape_cast %168 : vector<16x16xf32> to vector<2x8x16xf32>
    %170 = tpu.concatenate %167, %169 in 0 : vector<2x8x16xf32>, vector<2x8x16xf32> -> vector<4x8x16xf32>
    %171 = arith.truncf %170 : vector<4x8x16xf32> to vector<4x8x16xbf16>
    "tpu.trace_start"() <{level = 10 : i32, message = "bqd,bkd->bqk"}> : () -> ()
    %cst_44 = arith.constant dense<0.000000e+00> : vector<4x8x8xf32>
    %172 = tpu.matmul %157, %164, %cst_44 {dimension_numbers = #tpu.dot_dimension_numbers<[2], [2], [1], [1], [0, 0, 0, 1, 1, 1], [0], [0]>} : vector<4x8x16xbf16>, vector<4x8x16xbf16>, vector<4x8x8xf32> -> vector<4x8x8xf32>
    "tpu.trace_stop"() : () -> ()
    %cst_45 = arith.constant 2.500000e-01 : f32
    %173 = vector.broadcast %cst_45 : f32 to vector<4x8x8xf32>
    %174 = arith.mulf %172, %173 : vector<4x8x8xf32>
    %cst_46 = arith.constant dense<0xFF800000> : vector<4x8xf32>
    %175 = vector.multi_reduction <maximumf>, %174, %cst_46 [2] : vector<4x8x8xf32> to vector<4x8xf32>
    %176 = vector.shape_cast %175 : vector<4x8xf32> to vector<4x8x1xf32>
    %177 = vector.broadcast %176 : vector<4x8x1xf32> to vector<4x8x8xf32>
    %178 = arith.subf %174, %177 : vector<4x8x8xf32>
    %179 = math.exp %178 : vector<4x8x8xf32>
    %cst_47 = arith.constant dense<0.000000e+00> : vector<4x8xf32>
    %180 = vector.multi_reduction <add>, %179, %cst_47 [2] : vector<4x8x8xf32> to vector<4x8xf32>
    %181 = vector.shape_cast %180 : vector<4x8xf32> to vector<4x8x1xf32>
    %182 = tpu.reciprocal %181 {approx = true} : vector<4x8x1xf32> -> vector<4x8x1xf32>
    %183 = vector.broadcast %182 : vector<4x8x1xf32> to vector<4x8x8xf32>
    %184 = arith.mulf %179, %183 : vector<4x8x8xf32>
    %185 = arith.truncf %184 : vector<4x8x8xf32> to vector<4x8x8xbf16>
    "tpu.trace_start"() <{level = 10 : i32, message = "bqk,bkd->bqd"}> : () -> ()
    %cst_48 = arith.constant dense<0.000000e+00> : vector<4x8x16xf32>
    %186 = tpu.matmul %185, %171, %cst_48 {dimension_numbers = #tpu.dot_dimension_numbers<[2], [1], [1], [2], [0, 0, 0, 1, 1, 2], [0], [0]>} : vector<4x8x8xbf16>, vector<4x8x16xbf16>, vector<4x8x16xf32> -> vector<4x8x16xf32>
    "tpu.trace_stop"() : () -> ()
    %187 = vector.extract_strided_slice %186 {offsets = [0, 0, 0], sizes = [2, 8, 16], strides = [1, 1, 1]} : vector<4x8x16xf32> to vector<2x8x16xf32>
    %188 = vector.shape_cast %187 : vector<2x8x16xf32> to vector<16x16xf32>
    %189 = vector.extract_strided_slice %186 {offsets = [2, 0, 0], sizes = [2, 8, 16], strides = [1, 1, 1]} : vector<4x8x16xf32> to vector<2x8x16xf32>
    %190 = vector.shape_cast %189 : vector<2x8x16xf32> to vector<16x16xf32>
    %191 = tpu.concatenate %188, %190 in 1 : vector<16x16xf32>, vector<16x16xf32> -> vector<16x32xf32>
    %192 = arith.truncf %191 : vector<16x32xf32> to vector<16x32xbf16>
    %c1_49 = arith.constant 1 : index
    %c0_50 = arith.constant 0 : index
    %c0_51 = arith.constant 0 : index
    %193 = vector.load %arg2[%c1_49, %c0_50, %c0_51] : memref<2x32x32xbf16, #tpu.memory_space<vmem>>, vector<1x32x32xbf16>
    %194 = vector.shape_cast %193 : vector<1x32x32xbf16> to vector<32x32xbf16>
    %cst_52 = arith.constant dense<0.000000e+00> : vector<16x32xf32>
    %195 = tpu.matmul %192, %194, %cst_52 {dimension_numbers = #tpu.dot_dimension_numbers<[1], [0], [0], [1], [0, 0, 1, 1], [], []>} : vector<16x32xbf16>, vector<32x32xbf16>, vector<16x32xf32> -> vector<16x32xf32>
    %196 = vector.broadcast %138 : vector<1x32xf32> to vector<16x32xf32>
    %197 = arith.addf %195, %196 : vector<16x32xf32>
    %198 = arith.addf %134, %197 : vector<16x32xf32>
    %cst_53 = arith.constant dense<0.000000e+00> : vector<16xf32>
    %199 = vector.multi_reduction <add>, %198, %cst_53 [1] : vector<16x32xf32> to vector<16xf32>
    %200 = vector.shape_cast %199 : vector<16xf32> to vector<16x1xf32>
    %cst_54 = arith.constant 3.200000e+01 : f32
    %201 = vector.broadcast %cst_54 : f32 to vector<16x1xf32>
    %202 = arith.divf %200, %201 : vector<16x1xf32>
    %203 = vector.broadcast %202 : vector<16x1xf32> to vector<16x32xf32>
    %204 = arith.subf %198, %203 : vector<16x32xf32>
    %205 = arith.mulf %204, %204 : vector<16x32xf32>
    %cst_55 = arith.constant dense<0.000000e+00> : vector<16xf32>
    %206 = vector.multi_reduction <add>, %205, %cst_55 [1] : vector<16x32xf32> to vector<16xf32>
    %207 = vector.shape_cast %206 : vector<16xf32> to vector<16x1xf32>
    %cst_56 = arith.constant 3.200000e+01 : f32
    %208 = vector.broadcast %cst_56 : f32 to vector<16x1xf32>
    %209 = arith.divf %207, %208 : vector<16x1xf32>
    %210 = vector.broadcast %202 : vector<16x1xf32> to vector<16x32xf32>
    %211 = arith.subf %198, %210 : vector<16x32xf32>
    %cst_57 = arith.constant 9.99999996E-13 : f32
    %212 = vector.broadcast %cst_57 : f32 to vector<16x1xf32>
    %213 = arith.addf %209, %212 : vector<16x1xf32>
    %214 = math.rsqrt %213 : vector<16x1xf32>
    %215 = vector.broadcast %214 : vector<16x1xf32> to vector<16x32xf32>
    %216 = arith.mulf %211, %215 : vector<16x32xf32>
    %217 = vector.broadcast %139 : vector<1x32xf32> to vector<16x32xf32>
    %218 = arith.mulf %216, %217 : vector<16x32xf32>
    %219 = vector.broadcast %140 : vector<1x32xf32> to vector<16x32xf32>
    %220 = arith.addf %218, %219 : vector<16x32xf32>
    %221 = arith.truncf %220 : vector<16x32xf32> to vector<16x32xbf16>
    %c1_58 = arith.constant 1 : index
    %c0_59 = arith.constant 0 : index
    %c0_60 = arith.constant 0 : index
    %222 = vector.load %arg3[%c1_58, %c0_59, %c0_60] : memref<2x32x64xbf16, #tpu.memory_space<vmem>>, vector<1x32x64xbf16>
    %223 = vector.shape_cast %222 : vector<1x32x64xbf16> to vector<32x64xbf16>
    %cst_61 = arith.constant dense<0.000000e+00> : vector<16x64xf32>
    %224 = tpu.matmul %221, %223, %cst_61 {dimension_numbers = #tpu.dot_dimension_numbers<[1], [0], [0], [1], [0, 0, 1, 1], [], []>} : vector<16x32xbf16>, vector<32x64xbf16>, vector<16x64xf32> -> vector<16x64xf32>
    %225 = vector.broadcast %141 : vector<1x64xf32> to vector<16x64xf32>
    %226 = arith.addf %224, %225 : vector<16x64xf32>
    %cst_62 = arith.constant 5.000000e-01 : f32
    %227 = vector.broadcast %cst_62 : f32 to vector<16x64xf32>
    %228 = arith.mulf %227, %226 : vector<16x64xf32>
    %cst_63 = arith.constant 4.471500e-02 : f32
    %229 = vector.broadcast %cst_63 : f32 to vector<16x64xf32>
    %230 = arith.mulf %229, %226 : vector<16x64xf32>
    %231 = arith.mulf %230, %226 : vector<16x64xf32>
    %232 = arith.mulf %231, %226 : vector<16x64xf32>
    %233 = arith.addf %226, %232 : vector<16x64xf32>
    %cst_64 = arith.constant 0.797884583 : f32
    %234 = vector.broadcast %cst_64 : f32 to vector<16x64xf32>
    %235 = arith.mulf %234, %233 : vector<16x64xf32>
    %236 = math.tanh %235 : vector<16x64xf32>
    %cst_65 = arith.constant 1.000000e+00 : f32
    %237 = vector.broadcast %cst_65 : f32 to vector<16x64xf32>
    %238 = arith.addf %237, %236 : vector<16x64xf32>
    %239 = arith.mulf %228, %238 : vector<16x64xf32>
    %240 = arith.truncf %239 : vector<16x64xf32> to vector<16x64xbf16>
    %c1_66 = arith.constant 1 : index
    %c0_67 = arith.constant 0 : index
    %c0_68 = arith.constant 0 : index
    %241 = vector.load %arg4[%c1_66, %c0_67, %c0_68] : memref<2x64x32xbf16, #tpu.memory_space<vmem>>, vector<1x64x32xbf16>
    %242 = vector.shape_cast %241 : vector<1x64x32xbf16> to vector<64x32xbf16>
    %cst_69 = arith.constant dense<0.000000e+00> : vector<16x32xf32>
    %243 = tpu.matmul %240, %242, %cst_69 {dimension_numbers = #tpu.dot_dimension_numbers<[1], [0], [0], [1], [0, 0, 1, 1], [], []>} : vector<16x64xbf16>, vector<64x32xbf16>, vector<16x32xf32> -> vector<16x32xf32>
    %244 = vector.broadcast %142 : vector<1x32xf32> to vector<16x32xf32>
    %245 = arith.addf %243, %244 : vector<16x32xf32>
    %246 = arith.addf %220, %245 : vector<16x32xf32>
    %cst_70 = arith.constant dense<0.000000e+00> : vector<16xf32>
    %247 = vector.multi_reduction <add>, %246, %cst_70 [1] : vector<16x32xf32> to vector<16xf32>
    %248 = vector.shape_cast %247 : vector<16xf32> to vector<16x1xf32>
    %cst_71 = arith.constant 3.200000e+01 : f32
    %249 = vector.broadcast %cst_71 : f32 to vector<16x1xf32>
    %250 = arith.divf %248, %249 : vector<16x1xf32>
    %251 = vector.broadcast %250 : vector<16x1xf32> to vector<16x32xf32>
    %252 = arith.subf %246, %251 : vector<16x32xf32>
    %253 = arith.mulf %252, %252 : vector<16x32xf32>
    %cst_72 = arith.constant dense<0.000000e+00> : vector<16xf32>
    %254 = vector.multi_reduction <add>, %253, %cst_72 [1] : vector<16x32xf32> to vector<16xf32>
    %255 = vector.shape_cast %254 : vector<16xf32> to vector<16x1xf32>
    %cst_73 = arith.constant 3.200000e+01 : f32
    %256 = vector.broadcast %cst_73 : f32 to vector<16x1xf32>
    %257 = arith.divf %255, %256 : vector<16x1xf32>
    %258 = vector.broadcast %250 : vector<16x1xf32> to vector<16x32xf32>
    %259 = arith.subf %246, %258 : vector<16x32xf32>
    %cst_74 = arith.constant 9.99999996E-13 : f32
    %260 = vector.broadcast %cst_74 : f32 to vector<16x1xf32>
    %261 = arith.addf %257, %260 : vector<16x1xf32>
    %262 = math.rsqrt %261 : vector<16x1xf32>
    %263 = vector.broadcast %262 : vector<16x1xf32> to vector<16x32xf32>
    %264 = arith.mulf %259, %263 : vector<16x32xf32>
    %265 = vector.broadcast %143 : vector<1x32xf32> to vector<16x32xf32>
    %266 = arith.mulf %264, %265 : vector<16x32xf32>
    %267 = vector.broadcast %144 : vector<1x32xf32> to vector<16x32xf32>
    %268 = arith.addf %266, %267 : vector<16x32xf32>
    %c0_75 = arith.constant 0 : index
    %c0_76 = arith.constant 0 : index
    %269 = vector.load %arg8[%c0_75, %c0_76] : memref<4x128xf32, #tpu.memory_space<vmem>>, vector<1x128xf32>
    %270 = arith.truncf %268 : vector<16x32xf32> to vector<16x32xbf16>
    %c0_77 = arith.constant 0 : index
    %c0_78 = arith.constant 0 : index
    %271 = vector.load %arg6[%c0_77, %c0_78] : memref<32x128xbf16, #tpu.memory_space<vmem>>, vector<32x128xbf16>
    %cst_79 = arith.constant dense<0.000000e+00> : vector<16x128xf32>
    %272 = tpu.matmul %270, %271, %cst_79 {dimension_numbers = #tpu.dot_dimension_numbers<[1], [0], [0], [1], [0, 0, 1, 1], [], []>} : vector<16x32xbf16>, vector<32x128xbf16>, vector<16x128xf32> -> vector<16x128xf32>
    %273 = vector.broadcast %269 : vector<1x128xf32> to vector<16x128xf32>
    %274 = arith.addf %272, %273 : vector<16x128xf32>
    %c0_80 = arith.constant 0 : index
    %c0_81 = arith.constant 0 : index
    %275 = vector.load %arg10[%c0_80, %c0_81] : memref<16x128xf32, #tpu.memory_space<vmem>>, vector<16x128xf32>
    tpu.vector_store %arg10[%c0_80, %c0_81], %274 {strides = array<i32>} : memref<16x128xf32, #tpu.memory_space<vmem>>, vector<16x128xf32>,
    %c1_82 = arith.constant 1 : index
    %c0_83 = arith.constant 0 : index
    %276 = vector.load %arg8[%c1_82, %c0_83] : memref<4x128xf32, #tpu.memory_space<vmem>>, vector<1x128xf32>
    %c2 = arith.constant 2 : index
    %c0_84 = arith.constant 0 : index
    %277 = vector.load %arg8[%c2, %c0_84] : memref<4x128xf32, #tpu.memory_space<vmem>>, vector<1x128xf32>
    %c0_85 = arith.constant 0 : index
    %c0_86 = arith.constant 0 : index
    %278 = vector.load %arg7[%c0_85, %c0_86] : memref<128x128xf32, #tpu.memory_space<vmem>>, vector<128x128xf32>
    %cst_87 = arith.constant dense<0xFF800000> : vector<128xf32>
    %279 = vector.multi_reduction <maximumf>, %278, %cst_87 [1] : vector<128x128xf32> to vector<128xf32>
    %280 = vector.shape_cast %279 : vector<128xf32> to vector<128x1xf32>
    %cst_88 = arith.constant dense<0xFF800000> : vector<1xf32>
    %281 = vector.multi_reduction <maximumf>, %280, %cst_88 [0] : vector<128x1xf32> to vector<1xf32>
    %282 = vector.shape_cast %281 : vector<1xf32> to vector<1x1xf32>
    %283 = vector.broadcast %282 : vector<1x1xf32> to vector<128x128xf32>
    %284 = arith.subf %278, %283 : vector<128x128xf32>
    %285 = math.exp %284 : vector<128x128xf32>
    %286 = vector.shape_cast %274 : vector<16x128xf32> to vector<2x8x128xf32>
    %c0_89 = arith.constant 0 : index
    %c0_90 = arith.constant 0 : index
    %287 = vector.load %arg9[%c0_89, %c0_90] : memref<2x8xf32, #tpu.memory_space<vmem>>, vector<2x8xf32>
    %288 = vector.extract_strided_slice %286 {offsets = [0, 0, 0], sizes = [2, 1, 128], strides = [1, 1, 1]} : vector<2x8x128xf32> to vector<2x1x128xf32>
    %289 = vector.shape_cast %288 : vector<2x1x128xf32> to vector<2x128xf32>
    %290 = vector.broadcast %276 : vector<1x128xf32> to vector<2x128xf32>
    %291 = arith.addf %290, %289 : vector<2x128xf32>
    %cst_91 = arith.constant dense<0xFF800000> : vector<2xf32>
    %292 = vector.multi_reduction <maximumf>, %291, %cst_91 [1] : vector<2x128xf32> to vector<2xf32>
    %293 = vector.shape_cast %292 : vector<2xf32> to vector<2x1xf32>
    %294 = vector.broadcast %293 : vector<2x1xf32> to vector<2x128xf32>
    %295 = arith.subf %291, %294 : vector<2x128xf32>
    %296 = math.exp %295 : vector<2x128xf32>
    %cst_92 = arith.constant dense<0.000000e+00> : vector<2x128xf32>
    %297 = tpu.matmul %296, %285, %cst_92 {dimension_numbers = #tpu.dot_dimension_numbers<[1], [0], [0], [1], [0, 0, 1, 1], [], []>} : vector<2x128xf32>, vector<128x128xf32>, vector<2x128xf32> -> vector<2x128xf32>
    %298 = vector.broadcast %282 : vector<1x1xf32> to vector<2x1xf32>
    %299 = arith.addf %293, %298 : vector<2x1xf32>
    %300 = math.log %297 : vector<2x128xf32>
    %301 = vector.broadcast %299 : vector<2x1xf32> to vector<2x128xf32>
    %302 = arith.addf %301, %300 : vector<2x128xf32>
    %303 = vector.extract_strided_slice %286 {offsets = [0, 1, 0], sizes = [2, 1, 128], strides = [1, 1, 1]} : vector<2x8x128xf32> to vector<2x1x128xf32>
    %304 = vector.shape_cast %303 : vector<2x1x128xf32> to vector<2x128xf32>
    %305 = arith.addf %302, %304 : vector<2x128xf32>
    %306 = vector.extract_strided_slice %287 {offsets = [0, 1], sizes = [2, 1], strides = [1, 1]} : vector<2x8xf32> to vector<2x1xf32>
    %cst_93 = arith.constant 0.000000e+00 : f32
    %307 = vector.broadcast %cst_93 : f32 to vector<2x1xf32>
    %308 = arith.cmpf ogt, %306, %307 : vector<2x1xf32>
    %309 = vector.shape_cast %308 : vector<2x1xi1> to vector<2x1xi1>
    %310 = vector.broadcast %309 : vector<2x1xi1> to vector<2x128xi1>
    %311 = arith.select %310, %305, %291 : vector<2x128xi1>, vector<2x128xf32>
    %cst_94 = arith.constant dense<0xFF800000> : vector<2xf32>
    %312 = vector.multi_reduction <maximumf>, %311, %cst_94 [1] : vector<2x128xf32> to vector<2xf32>
    %313 = vector.shape_cast %312 : vector<2xf32> to vector<2x1xf32>
    %314 = vector.broadcast %313 : vector<2x1xf32> to vector<2x128xf32>
    %315 = arith.subf %311, %314 : vector<2x128xf32>
    %316 = math.exp %315 : vector<2x128xf32>
    %cst_95 = arith.constant dense<0.000000e+00> : vector<2x128xf32>
    %317 = tpu.matmul %316, %285, %cst_95 {dimension_numbers = #tpu.dot_dimension_numbers<[1], [0], [0], [1], [0, 0, 1, 1], [], []>} : vector<2x128xf32>, vector<128x128xf32>, vector<2x128xf32> -> vector<2x128xf32>
    %318 = vector.broadcast %282 : vector<1x1xf32> to vector<2x1xf32>
    %319 = arith.addf %313, %318 : vector<2x1xf32>
    %320 = math.log %317 : vector<2x128xf32>
    %321 = vector.broadcast %319 : vector<2x1xf32> to vector<2x128xf32>
    %322 = arith.addf %321, %320 : vector<2x128xf32>
    %323 = vector.extract_strided_slice %286 {offsets = [0, 2, 0], sizes = [2, 1, 128], strides = [1, 1, 1]} : vector<2x8x128xf32> to vector<2x1x128xf32>
    %324 = vector.shape_cast %323 : vector<2x1x128xf32> to vector<2x128xf32>
    %325 = arith.addf %322, %324 : vector<2x128xf32>
    %326 = vector.extract_strided_slice %287 {offsets = [0, 2], sizes = [2, 1], strides = [1, 1]} : vector<2x8xf32> to vector<2x1xf32>
    %cst_96 = arith.constant 0.000000e+00 : f32
    %327 = vector.broadcast %cst_96 : f32 to vector<2x1xf32>
    %328 = arith.cmpf ogt, %326, %327 : vector<2x1xf32>
    %329 = vector.shape_cast %328 : vector<2x1xi1> to vector<2x1xi1>
    %330 = vector.broadcast %329 : vector<2x1xi1> to vector<2x128xi1>
    %331 = arith.select %330, %325, %311 : vector<2x128xi1>, vector<2x128xf32>
    %cst_97 = arith.constant dense<0xFF800000> : vector<2xf32>
    %332 = vector.multi_reduction <maximumf>, %331, %cst_97 [1] : vector<2x128xf32> to vector<2xf32>
    %333 = vector.shape_cast %332 : vector<2xf32> to vector<2x1xf32>
    %334 = vector.broadcast %333 : vector<2x1xf32> to vector<2x128xf32>
    %335 = arith.subf %331, %334 : vector<2x128xf32>
    %336 = math.exp %335 : vector<2x128xf32>
    %cst_98 = arith.constant dense<0.000000e+00> : vector<2x128xf32>
    %337 = tpu.matmul %336, %285, %cst_98 {dimension_numbers = #tpu.dot_dimension_numbers<[1], [0], [0], [1], [0, 0, 1, 1], [], []>} : vector<2x128xf32>, vector<128x128xf32>, vector<2x128xf32> -> vector<2x128xf32>
    %338 = vector.broadcast %282 : vector<1x1xf32> to vector<2x1xf32>
    %339 = arith.addf %333, %338 : vector<2x1xf32>
    %340 = math.log %337 : vector<2x128xf32>
    %341 = vector.broadcast %339 : vector<2x1xf32> to vector<2x128xf32>
    %342 = arith.addf %341, %340 : vector<2x128xf32>
    %343 = vector.extract_strided_slice %286 {offsets = [0, 3, 0], sizes = [2, 1, 128], strides = [1, 1, 1]} : vector<2x8x128xf32> to vector<2x1x128xf32>
    %344 = vector.shape_cast %343 : vector<2x1x128xf32> to vector<2x128xf32>
    %345 = arith.addf %342, %344 : vector<2x128xf32>
    %346 = vector.extract_strided_slice %287 {offsets = [0, 3], sizes = [2, 1], strides = [1, 1]} : vector<2x8xf32> to vector<2x1xf32>
    %cst_99 = arith.constant 0.000000e+00 : f32
    %347 = vector.broadcast %cst_99 : f32 to vector<2x1xf32>
    %348 = arith.cmpf ogt, %346, %347 : vector<2x1xf32>
    %349 = vector.shape_cast %348 : vector<2x1xi1> to vector<2x1xi1>
    %350 = vector.broadcast %349 : vector<2x1xi1> to vector<2x128xi1>
    %351 = arith.select %350, %345, %331 : vector<2x128xi1>, vector<2x128xf32>
    %cst_100 = arith.constant dense<0xFF800000> : vector<2xf32>
    %352 = vector.multi_reduction <maximumf>, %351, %cst_100 [1] : vector<2x128xf32> to vector<2xf32>
    %353 = vector.shape_cast %352 : vector<2xf32> to vector<2x1xf32>
    %354 = vector.broadcast %353 : vector<2x1xf32> to vector<2x128xf32>
    %355 = arith.subf %351, %354 : vector<2x128xf32>
    %356 = math.exp %355 : vector<2x128xf32>
    %cst_101 = arith.constant dense<0.000000e+00> : vector<2x128xf32>
    %357 = tpu.matmul %356, %285, %cst_101 {dimension_numbers = #tpu.dot_dimension_numbers<[1], [0], [0], [1], [0, 0, 1, 1], [], []>} : vector<2x128xf32>, vector<128x128xf32>, vector<2x128xf32> -> vector<2x128xf32>
    %358 = vector.broadcast %282 : vector<1x1xf32> to vector<2x1xf32>
    %359 = arith.addf %353, %358 : vector<2x1xf32>
    %360 = math.log %357 : vector<2x128xf32>
    %361 = vector.broadcast %359 : vector<2x1xf32> to vector<2x128xf32>
    %362 = arith.addf %361, %360 : vector<2x128xf32>
    %363 = vector.extract_strided_slice %286 {offsets = [0, 4, 0], sizes = [2, 1, 128], strides = [1, 1, 1]} : vector<2x8x128xf32> to vector<2x1x128xf32>
    %364 = vector.shape_cast %363 : vector<2x1x128xf32> to vector<2x128xf32>
    %365 = arith.addf %362, %364 : vector<2x128xf32>
    %366 = vector.extract_strided_slice %287 {offsets = [0, 4], sizes = [2, 1], strides = [1, 1]} : vector<2x8xf32> to vector<2x1xf32>
    %cst_102 = arith.constant 0.000000e+00 : f32
    %367 = vector.broadcast %cst_102 : f32 to vector<2x1xf32>
    %368 = arith.cmpf ogt, %366, %367 : vector<2x1xf32>
    %369 = vector.shape_cast %368 : vector<2x1xi1> to vector<2x1xi1>
    %370 = vector.broadcast %369 : vector<2x1xi1> to vector<2x128xi1>
    %371 = arith.select %370, %365, %351 : vector<2x128xi1>, vector<2x128xf32>
    %cst_103 = arith.constant dense<0xFF800000> : vector<2xf32>
    %372 = vector.multi_reduction <maximumf>, %371, %cst_103 [1] : vector<2x128xf32> to vector<2xf32>
    %373 = vector.shape_cast %372 : vector<2xf32> to vector<2x1xf32>
    %374 = vector.broadcast %373 : vector<2x1xf32> to vector<2x128xf32>
    %375 = arith.subf %371, %374 : vector<2x128xf32>
    %376 = math.exp %375 : vector<2x128xf32>
    %cst_104 = arith.constant dense<0.000000e+00> : vector<2x128xf32>
    %377 = tpu.matmul %376, %285, %cst_104 {dimension_numbers = #tpu.dot_dimension_numbers<[1], [0], [0], [1], [0, 0, 1, 1], [], []>} : vector<2x128xf32>, vector<128x128xf32>, vector<2x128xf32> -> vector<2x128xf32>
    %378 = vector.broadcast %282 : vector<1x1xf32> to vector<2x1xf32>
    %379 = arith.addf %373, %378 : vector<2x1xf32>
    %380 = math.log %377 : vector<2x128xf32>
    %381 = vector.broadcast %379 : vector<2x1xf32> to vector<2x128xf32>
    %382 = arith.addf %381, %380 : vector<2x128xf32>
    %383 = vector.extract_strided_slice %286 {offsets = [0, 5, 0], sizes = [2, 1, 128], strides = [1, 1, 1]} : vector<2x8x128xf32> to vector<2x1x128xf32>
    %384 = vector.shape_cast %383 : vector<2x1x128xf32> to vector<2x128xf32>
    %385 = arith.addf %382, %384 : vector<2x128xf32>
    %386 = vector.extract_strided_slice %287 {offsets = [0, 5], sizes = [2, 1], strides = [1, 1]} : vector<2x8xf32> to vector<2x1xf32>
    %cst_105 = arith.constant 0.000000e+00 : f32
    %387 = vector.broadcast %cst_105 : f32 to vector<2x1xf32>
    %388 = arith.cmpf ogt, %386, %387 : vector<2x1xf32>
    %389 = vector.shape_cast %388 : vector<2x1xi1> to vector<2x1xi1>
    %390 = vector.broadcast %389 : vector<2x1xi1> to vector<2x128xi1>
    %391 = arith.select %390, %385, %371 : vector<2x128xi1>, vector<2x128xf32>
    %cst_106 = arith.constant dense<0xFF800000> : vector<2xf32>
    %392 = vector.multi_reduction <maximumf>, %391, %cst_106 [1] : vector<2x128xf32> to vector<2xf32>
    %393 = vector.shape_cast %392 : vector<2xf32> to vector<2x1xf32>
    %394 = vector.broadcast %393 : vector<2x1xf32> to vector<2x128xf32>
    %395 = arith.subf %391, %394 : vector<2x128xf32>
    %396 = math.exp %395 : vector<2x128xf32>
    %cst_107 = arith.constant dense<0.000000e+00> : vector<2x128xf32>
    %397 = tpu.matmul %396, %285, %cst_107 {dimension_numbers = #tpu.dot_dimension_numbers<[1], [0], [0], [1], [0, 0, 1, 1], [], []>} : vector<2x128xf32>, vector<128x128xf32>, vector<2x128xf32> -> vector<2x128xf32>
    %398 = vector.broadcast %282 : vector<1x1xf32> to vector<2x1xf32>
    %399 = arith.addf %393, %398 : vector<2x1xf32>
    %400 = math.log %397 : vector<2x128xf32>
    %401 = vector.broadcast %399 : vector<2x1xf32> to vector<2x128xf32>
    %402 = arith.addf %401, %400 : vector<2x128xf32>
    %403 = vector.extract_strided_slice %286 {offsets = [0, 6, 0], sizes = [2, 1, 128], strides = [1, 1, 1]} : vector<2x8x128xf32> to vector<2x1x128xf32>
    %404 = vector.shape_cast %403 : vector<2x1x128xf32> to vector<2x128xf32>
    %405 = arith.addf %402, %404 : vector<2x128xf32>
    %406 = vector.extract_strided_slice %287 {offsets = [0, 6], sizes = [2, 1], strides = [1, 1]} : vector<2x8xf32> to vector<2x1xf32>
    %cst_108 = arith.constant 0.000000e+00 : f32
    %407 = vector.broadcast %cst_108 : f32 to vector<2x1xf32>
    %408 = arith.cmpf ogt, %406, %407 : vector<2x1xf32>
    %409 = vector.shape_cast %408 : vector<2x1xi1> to vector<2x1xi1>
    %410 = vector.broadcast %409 : vector<2x1xi1> to vector<2x128xi1>
    %411 = arith.select %410, %405, %391 : vector<2x128xi1>, vector<2x128xf32>
    %cst_109 = arith.constant dense<0xFF800000> : vector<2xf32>
    %412 = vector.multi_reduction <maximumf>, %411, %cst_109 [1] : vector<2x128xf32> to vector<2xf32>
    %413 = vector.shape_cast %412 : vector<2xf32> to vector<2x1xf32>
    %414 = vector.broadcast %413 : vector<2x1xf32> to vector<2x128xf32>
    %415 = arith.subf %411, %414 : vector<2x128xf32>
    %416 = math.exp %415 : vector<2x128xf32>
    %cst_110 = arith.constant dense<0.000000e+00> : vector<2x128xf32>
    %417 = tpu.matmul %416, %285, %cst_110 {dimension_numbers = #tpu.dot_dimension_numbers<[1], [0], [0], [1], [0, 0, 1, 1], [], []>} : vector<2x128xf32>, vector<128x128xf32>, vector<2x128xf32> -> vector<2x128xf32>
    %418 = vector.broadcast %282 : vector<1x1xf32> to vector<2x1xf32>
    %419 = arith.addf %413, %418 : vector<2x1xf32>
    %420 = math.log %417 : vector<2x128xf32>
    %421 = vector.broadcast %419 : vector<2x1xf32> to vector<2x128xf32>
    %422 = arith.addf %421, %420 : vector<2x128xf32>
    %423 = vector.extract_strided_slice %286 {offsets = [0, 7, 0], sizes = [2, 1, 128], strides = [1, 1, 1]} : vector<2x8x128xf32> to vector<2x1x128xf32>
    %424 = vector.shape_cast %423 : vector<2x1x128xf32> to vector<2x128xf32>
    %425 = arith.addf %422, %424 : vector<2x128xf32>
    %426 = vector.extract_strided_slice %287 {offsets = [0, 7], sizes = [2, 1], strides = [1, 1]} : vector<2x8xf32> to vector<2x1xf32>
    %cst_111 = arith.constant 0.000000e+00 : f32
    %427 = vector.broadcast %cst_111 : f32 to vector<2x1xf32>
    %428 = arith.cmpf ogt, %426, %427 : vector<2x1xf32>
    %429 = vector.shape_cast %428 : vector<2x1xi1> to vector<2x1xi1>
    %430 = vector.broadcast %429 : vector<2x1xi1> to vector<2x128xi1>
    %431 = arith.select %430, %425, %411 : vector<2x128xi1>, vector<2x128xf32>
    %432 = vector.broadcast %277 : vector<1x128xf32> to vector<2x128xf32>
    %433 = arith.addf %431, %432 : vector<2x128xf32>
    %cst_112 = arith.constant dense<0xFF800000> : vector<2xf32>
    %434 = vector.multi_reduction <maximumf>, %433, %cst_112 [1] : vector<2x128xf32> to vector<2xf32>
    %435 = vector.shape_cast %434 : vector<2xf32> to vector<2x1xf32>
    %436 = vector.broadcast %435 : vector<2x1xf32> to vector<2x128xf32>
    %437 = arith.subf %433, %436 : vector<2x128xf32>
    %438 = math.exp %437 : vector<2x128xf32>
    %cst_113 = arith.constant dense<0.000000e+00> : vector<2xf32>
    %439 = vector.multi_reduction <add>, %438, %cst_113 [1] : vector<2x128xf32> to vector<2xf32>
    %440 = vector.shape_cast %439 : vector<2xf32> to vector<2x1xf32>
    %441 = math.log %440 : vector<2x1xf32>
    %442 = arith.addf %435, %441 : vector<2x1xf32>
    %443 = vector.shape_cast %442 : vector<2x1xf32> to vector<2x1xf32>
    %444 = vector.broadcast %443 : vector<2x1xf32> to vector<2x128xf32>
    %c0_114 = arith.constant 0 : index
    %c0_115 = arith.constant 0 : index
    %445 = vector.load %arg11[%c0_114, %c0_115] : memref<2x128xf32, #tpu.memory_space<vmem>>, vector<2x128xf32>
    tpu.vector_store %arg11[%c0_114, %c0_115], %444 {strides = array<i32>} : memref<2x128xf32, #tpu.memory_space<vmem>>, vector<2x128xf32>,
    return
  }
}

</mosaic_0001>

<bundles_post_ra>
// kernel: tpu_custom_call.1
= control target key start
LH: loop header
LB: loop body
LE: loop exit
PB: predicated region body
PF: predicated region fallthrough
CT: control target
= control target key end

     0   :  { %17 = vsyncpa [#allocation3], 0  ;;  %s2831_s0 = inlined_call_operand.hbm [shape: f32[16,32], index: 0, kind: input, shape index: {}]   ;;  %s2832_s1 = inlined_call_operand.vmem [shape: bf16[2,32,96], index: 1, kind: input, shape index: {}]   ;;  %s2833_s2 = inlined_call_operand.vmem [shape: bf16[2,32,32], index: 2, kind: input, shape index: {}]   ;;  %s2834_s3 = inlined_call_operand.vmem [shape: bf16[2,32,64], index: 3, kind: input, shape index: {}]   ;;  %s2835_s4 = inlined_call_operand.vmem [shape: bf16[2,64,32], index: 4, kind: input, shape index: {}]   ;;  %s2836_s5 = inlined_call_operand.hbm [shape: f32[2,8,96], index: 5, kind: input, shape index: {}]   ;;  %s2837_s6 = inlined_call_operand.hbm [shape: bf16[32,128], index: 6, kind: input, shape index: {}]   ;;  %s2838_s7 = inlined_call_operand.hbm [shape: f32[128,128], index: 7, kind: input, shape index: {}]   ;;  %s2839_s8 = inlined_call_operand.vmem [shape: f32[4,128], index: 8, kind: input, shape index: {}]   ;;  %s2840_s9 = inlined_call_operand.vmem [shape: f32[2,8], index: 9, kind: input, shape index: {}]   ;;  %s2841_s10 = inlined_call_operand.hbm [shape: f32[16,128], index: 10, kind: output, shape index: {0}]   ;;  %s2842_s11 = inlined_call_operand.hbm [shape: f32[2,128], index: 11, kind: output, shape index: {1}]  }
   0x1   :  { %18 = vsyncpa [#allocation6], 0 }
   0x2   :  { %19 = vsyncpa [#allocation9], 0 }
   0x3   :  { %20 = vsyncpa [#allocation4], 0 }
   0x4   :  { %21 = vsyncpa [#allocation12], 0  ;;  %s47_s19 = sshll.u32 %s2836_s5, 4  ;;  %s2162_s20 = smov [#allocation5]   ;;  %s48_s19 = int_to_ptr.hbm [resolvable:$true] %s47_s19 }
   0x5   :  { %s49_s21 = sshll.u32 %s2162_s20, 4  ;;  %s26_s24 = sshll.u32 %s2831_s0, 4  ;;  %s50_s21 = int_to_ptr.vmem [resolvable:$true] %s49_s21  ;;  %s27_s24 = int_to_ptr.hbm [resolvable:$true] %s26_s24 }
   0x6   :  { %s2163_s25 = smov 128   ;;  %s2164_s26 = smov 8  }
   0x7   :  { %55 = dma.hbm_to_vmem [thread:$0]  %s48_s19, 256, %s50_s21, [#allocation6], %s2163_s25, %s2163_s25, %s2164_s26  }
   0x8   :  { %s2165_s27 = smov [#allocation2]   ;;  %s60_s5 = sshll.u32 %s2837_s6, 4  ;;  %s61_s5 = int_to_ptr.hbm [resolvable:$true] %s60_s5 }
   0x9   :  { %s28_s28 = sshll.u32 %s2165_s27, 4  ;;  %s2166_s0 = smov [#allocation7]   ;;  %s29_s28 = int_to_ptr.vmem [resolvable:$true] %s28_s28 }
   0xa   :  { %34 = dma.hbm_to_vmem [thread:$0]  %s27_s24, 256, %s29_s28, [#allocation3], %s2163_s25, %s2163_s25, %s2164_s26  }
   0xb   :  { %s62_s12 = sshll.u32 %s2166_s0, 4  ;;  %s73_s15 = sshll.u32 %s2838_s7, 4  ;;  %s63_s12 = int_to_ptr.vmem [resolvable:$true] %s62_s12  ;;  %s74_s15 = int_to_ptr.hbm [resolvable:$true] %s73_s15 }
   0xc   :  { %s2167_s16 = smov 64   ;;  %s2168_s17 = smov 4  }
   0xd   :  { %68 = dma.hbm_to_vmem [thread:$0]  %s61_s5, 256, %s63_s12, [#allocation6], %s2167_s16, %s2167_s16, %s2168_s17  }
   0xe   :  { %s2169_s6 = smov [#allocation8]  }
   0xf   :  { %s75_s18 = sshll.u32 %s2169_s6, 4  ;;  %s76_s18 = int_to_ptr.vmem [resolvable:$true] %s75_s18 }
  0x10   :  { %81 = dma.hbm_to_vmem [thread:$0]  %s74_s15, 2048, %s76_s18, [#allocation9], %s2163_s25, %s2163_s25, %s2164_s26  }
  0x11   :  { %2152 = dma.done.wait [#allocation3], 256  }
  0x12   :  { %2153 = vsyncadd [#allocation3], 4294967040 }
  0x13   :  { %2154 = dma.done.wait [#allocation6], 512  }
  0x14   :  { %2155 = vsyncadd [#allocation6], 4294966784 }
  0x15   :  { %2156 = dma.done.wait [#allocation9], 2048  }
  0x16   :  { %2157 = vsyncadd [#allocation9], 4294965248  ;;  %v1822_v0 = vld [vmem:[%s2832_s1 + $0x8] sm:$0xff]  ;;  %v1821_v1 = vld [vmem:[%s2832_s1] sm:$0xff]  ;;  %vm124_vm0 = vcmask 261120   ;;  %s2170_s22 = smov 112  }
  0x17   :  { %v2273_v2 = vld [vmem:[#allocation2] sm:$0xff]  ;;  %134 = vmatpush.bf16.msra.mxu0 %v1822_v0  ;;  %v2275_v3 = vld [vmem:[#allocation2 + $0x8] sm:$0xff]  ;;  %v2280_v5 = vld [vmem:[#allocation5] sm:$0xff]  ;;  %s2171_s23 = smov 96   ;;  %vm159_vm1 = vcmask 130048   ;;  %vm255_vm2 = vcmask 64512  }
  0x18   :  { %v106_v4 = vpack.c.bf16 %v2275_v3, %v2273_v2  ;;  %v111_v6 = vperm.slane %v2280_v5, 0  ;;  %vm309_vm3 = vcmask 1043456   ;;  %s2172_s28 = smov 16   ;;  %vm580_vm11 = vcmask 523264   ;;  %s1671_s30 = sshll.u32 %s2842_s11, 4  ;;  %s1672_s30 = int_to_ptr.hbm [resolvable:$true] %s1671_s30 }
  0x1b   :  { %135 = vmatpush.bf16.msra.mxu0 %v1821_v1 }
  0x1e   :  { %1696 = vmatmul.msk.bf16.vlgmr.msra.gmra.mxu0 %vm124_vm0, %v106_v4 }
  0x9b   :  { %v137_v7 = vpop.f32.mrf.mxu0 }
  0x9c   :  { %v138_v8 = vadd.f32 %v137_v7, %v111_v6 }
  0x9e   :  { %144 = vrot.lane.b32.xlu0 %v138_v8, %s2170_s22  ;;  %v150_v13 = vpack.c.bf16 %v138_v8, %v138_v8 }
  0xa0   :  { %v155_v15 = vunpack.c.l.b16 %v150_v13 }
  0xa2   :  { %v2289_v16 = vpack.c.b16 %v155_v15, %v155_v15 }
  0xa3   :  { %v139_v9 = vpop.f32.mrf.mxu0 }
  0xa4   :  { %v140_v10 = vadd.f32 %v139_v9, %v111_v6 }
  0xa6   :  { %v151_v11 = vpack.c.bf16 %v140_v10, %v140_v10  ;;  %146 = vrot.lane.b32.xlu0 %v140_v10, %s2170_s22 }
  0xa8   :  { %v180_v12 = vunpack.c.l.b16 %v151_v11 }
  0xaa   :  { %v2285_v14 = vpack.c.b16 %v180_v12, %v180_v12 }
  0xac   :  { %182 = vrot.lane.b32.xlu2 %v2285_v14, %s2171_s23 }
  0xb4   :  { %157 = vrot.lane.b32.xlu2 %v2289_v16, %s2171_s23 }
 0x106   :  { %v183_v17 = vpop.permute.xlu2 %182 }
 0x107   :  { %v188_v18 = vsel %vm159_vm1, %v183_v17, 0 }
 0x108   :  { %197 = vmatpush.bf16.xpose.msra.mxu2 %v188_v18 }
 0x10e   :  { %v158_v19 = vpop.permute.xlu2 %157 }
 0x10f   :  { %1698 = vmatmul.msk.bf16.vlgmr.msra.gmra.mxu2 %vm159_vm1, %v151_v11  ;;  %v164_v20 = vsel %vm159_vm1, %v158_v19, 0 }
 0x110   :  { %v145_v21 = vpop.permute.xlu0 %144  ;;  %173 = vmatpush.bf16.xpose.msra.mxu1 %v164_v20 }
 0x111   :  { %v152_v22 = vpack.c.bf16 %v145_v21, %v145_v21 }
 0x113   :  { %v204_v23 = vunpack.c.l.b16 %v152_v22 }
 0x115   :  { %v205_v24 = vpack.c.b16 %v204_v23, %v204_v23 }
 0x117   :  { %206 = vrot.lane.b32.xlu1 %v205_v24, %s2171_s23  ;;  %1697 = vmatmul.msk.bf16.vlgmr.msra.gmra.mxu1 %vm159_vm1, %v150_v13 }
 0x118   :  { %v147_v25 = vpop.permute.xlu0 %146 }
 0x119   :  { %v153_v26 = vpack.c.bf16 %v147_v25, %v147_v25 }
 0x11b   :  { %v228_v27 = vunpack.c.l.b16 %v153_v26 }
 0x11d   :  { %v2298_v28 = vpack.c.b16 %v228_v27, %v228_v27 }
 0x11f   :  { %230 = vrot.lane.b32.xlu1 %v2298_v28, %s2171_s23 }
 0x189   :  { %v207_v29 = vpop.permute.xlu1 %206 }
 0x18a   :  { %v212_v30 = vsel %vm159_vm1, %v207_v29, 0 }
 0x18b   :  { %221 = vmatpush.bf16.xpose.msra.mxu3 %v212_v30 }
 0x191   :  { %v231_v31 = vpop.permute.xlu1 %230 }
 0x192   :  { %v199_v32 = vpop.f32.mrf.mxu2  ;;  %1699 = vmatmul.msk.bf16.vlgmr.msra.gmra.mxu3 %vm159_vm1, %v152_v22  ;;  %v236_v33 = vsel %vm159_vm1, %v231_v31, 0 }
 0x193   :  { %v252_v34 = vmul.f32 0.25, %v199_v32  ;;  %245 = vmatpush.bf16.xpose.msrb.mxu0 %v236_v33  ;;  %v1824_v32 = vld [vmem:[%s2833_s2 + $0x8] sm:$0xff] }
 0x194   :  { %v175_v35 = vpop.f32.mrf.mxu1 }
 0x195   :  { %v259_v36 = vsel %vm255_vm2, %v252_v34, -inf  ;;  %v251_v37 = vmul.f32 0.25, %v175_v35 }
 0x196   :  { %260 = vmax.xlane.f32.xlu2 %v259_v36 }
 0x197   :  { %v256_v40 = vsel %vm255_vm2, %v251_v37, -inf }
 0x19a   :  { %v201_v38 = vpop.f32.mrf.mxu2  ;;  %1700 = vmatmul.msk.bf16.vlgmr.msrb.gmra.mxu0 %vm159_vm1, %v153_v26 }
 0x19c   :  { %v177_v39 = vpop.f32.mrf.mxu1 }
 0x19e   :  { %257 = vmax.xlane.f32.xlu2 %v256_v40 }
 0x1b6   :  { %347 = vrot.lane.b32.xlu2 %v205_v24, %s2167_s16 }
 0x209   :  { %v261_v41 = vpop.xlane.xlu2 %260 }
 0x20a   :  { %v269_v42 = vsub.f32 %v252_v34, %v261_v41 }
 0x20c   :  { %v274_v44 = vmul.f32 1.442695, %v269_v42  ;;  %v1823_v42 = vld [vmem:[%s2833_s2] sm:$0xff] }
 0x20e   :  { %1886 = vpow2.f32 %v274_v44 }
 0x211   :  { %v258_v43 = vpop.xlane.xlu2 %257 }
 0x212   :  { %v268_v50 = vsub.f32 %v251_v37, %v258_v43 }
 0x214   :  { %v272_v54 = vmul.f32 1.442695, %v268_v50  ;;  %v1887_v56 = vpop.eup %1886 }
 0x215   :  { %v223_v45 = vpop.f32.mrf.mxu3  ;;  %v283_v58 = vsel %vm255_vm2, %v1887_v56, 0.0 }
 0x216   :  { %v253_v46 = vmul.f32 0.25, %v223_v45  ;;  %1888 = vpow2.f32 %v272_v54 }
 0x217   :  { %v247_v47 = vpop.f32.mrf.mxu0 }
 0x218   :  { %v254_v48 = vmul.f32 0.25, %v247_v47  ;;  %v262_v49 = vsel %vm255_vm2, %v253_v46, -inf }
 0x219   :  { %263 = vmax.xlane.f32.xlu0 %v262_v49  ;;  %v348_v51 = vpop.permute.xlu2 %347  ;;  %v404_v49 = vperm.slane %v2280_v5, 1 }
 0x21a   :  { %v265_v52 = vsel %vm255_vm2, %v254_v48, -inf  ;;  %v353_v53 = vsel %vm309_vm3, %v348_v51, 0 }
 0x21b   :  { %266 = vmax.xlane.f32.xlu1 %v265_v52  ;;  %362 = vmatpush.bf16.msrb.mxu3 %v353_v53 }
 0x21c   :  { %v1889_v59 = vpop.eup %1888 }
 0x21d   :  { %v225_v55 = vpop.f32.mrf.mxu3  ;;  %v280_v60 = vsel %vm255_vm2, %v1889_v59, 0.0 }
 0x21f   :  { %v249_v57 = vpop.f32.mrf.mxu0 }
 0x223   :  { %284 = vadd.xlane.f32.xlu1 %v283_v58  ;;  %v2173_v58 = vmov 32.0  }
 0x22b   :  { %281 = vadd.xlane.f32.xlu1 %v280_v60 }
 0x28c   :  { %v264_v61 = vpop.xlane.xlu0 %263 }
 0x28d   :  { %v270_v62 = vsub.f32 %v253_v46, %v264_v61 }
 0x28e   :  { %v267_v63 = vpop.xlane.xlu1 %266 }
 0x28f   :  { %v276_v0 = vmul.f32 1.442695, %v270_v62  ;;  %v271_v1 = vsub.f32 %v254_v48, %v267_v63 }
 0x291   :  { %1890 = vpow2.f32 %v276_v0  ;;  %v278_v4 = vmul.f32 1.442695, %v271_v1 }
 0x293   :  { %1892 = vpow2.f32 %v278_v4 }
 0x296   :  { %v285_v10 = vpop.xlane.xlu1 %284 }
 0x297   :  { %v1891_v6 = vpop.eup %1890 }
 0x298   :  { %v286_v7 = vsel %vm255_vm2, %v1891_v6, 0.0 }
 0x299   :  { %v1893_v8 = vpop.eup %1892  ;;  %287 = vadd.xlane.f32.xlu0 %v286_v7 }
 0x29a   :  { %v289_v9 = vsel %vm255_vm2, %v1893_v8, 0.0 }
 0x29b   :  { %290 = vadd.xlane.f32.xlu1 %v289_v9 }
 0x29e   :  { %v282_v11 = vpop.xlane.xlu1 %281 }
 0x2ad   :  { %368 = vrot.lane.b32.xlu0 %v2298_v28, %s2167_s16 }
 0x2b4   :  { %326 = vrot.lane.b32.xlu1 %v2285_v14, %s2167_s16 }
 0x2b5   :  { %304 = vrot.lane.b32.xlu0 %v2289_v16, %s2167_s16 }
 0x30c   :  { %v288_v12 = vpop.xlane.xlu0 %287 }
 0x30d   :  { %1894 = vrcp.f32 %v288_v12  ;;  %v1826_v12 = vld [vmem:[%s2834_s3 + $0x8] sm:$0xff] }
 0x30e   :  { %v291_v13 = vpop.xlane.xlu1 %290 }
 0x30f   :  { %1896 = vrcp.f32 %v291_v13 }
 0x310   :  { %1898 = vrcp.f32 %v285_v10 }
 0x311   :  { %1900 = vrcp.f32 %v282_v11 }
 0x312   :  { %1902 = vrcp.f32 %v2173_v58 }
 0x313   :  { %v1895_v15 = vpop.eup %1894 }
 0x314   :  { %v298_v17 = vmul.f32 %v1895_v15, %v1891_v6 }
 0x315   :  { %v1897_v19 = vpop.eup %1896 }
 0x316   :  { %v302_v18 = vpack.c.bf16 %v298_v17, %v298_v17  ;;  %v299_v20 = vmul.f32 %v1897_v19, %v1893_v8  ;;  %v1899_v16 = vpop.eup %1898  ;;  %v1825_v17 = vld [vmem:[%s2834_s3] sm:$0xff] }
 0x317   :  { %v1901_v23 = vpop.eup %1900  ;;  %v297_v24 = vmul.f32 %v1899_v16, %v1887_v56 }
 0x318   :  { %1703 = vmatmul.msk.bf16.vlgmr.msrb.gmra.mxu3 %vm255_vm2, %v302_v18  ;;  %v303_v22 = vpack.c.bf16 %v299_v20, %v299_v20  ;;  %v296_v25 = vmul.f32 %v1901_v23, %v1889_v59  ;;  %v1903_v59 = vpop.eup %1902 }
 0x319   :  { %v301_v30 = vpack.c.bf16 %v297_v24, %v297_v24  ;;  %v443_v60 = vmul.f32 32.0, %v1903_v59  ;;  %vm447_vm4 = vweird.f32 %v1903_v59 }
 0x31a   :  { %v300_v31 = vpack.c.bf16 %v296_v25, %v296_v25 }
 0x31b   :  { %v444_v61 = vsub.f32 1.0, %v443_v60 }
 0x31d   :  { %v445_v62 = vmul.f32 %v1903_v59, %v444_v61 }
 0x31f   :  { %v369_v21 = vpop.permute.xlu0 %368  ;;  %v446_v63 = vadd.f32 %v1903_v59, %v445_v62 }
 0x320   :  { %v374_v14 = vsel %vm309_vm3, %v369_v21, 0 }
 0x321   :  { %383 = vmatpush.bf16.msra.mxu0 %v374_v14  ;;  %v2344_v0 = vsel %vm447_vm4, %v1903_v59, %v446_v63 }
 0x324   :  { %1704 = vmatmul.msk.bf16.vlgmr.msra.gmra.mxu0 %vm255_vm2, %v303_v22 }
 0x326   :  { %v327_v26 = vpop.permute.xlu1 %326 }
 0x327   :  { %v305_v27 = vpop.permute.xlu0 %304  ;;  %v332_v28 = vsel %vm309_vm3, %v327_v26, 0 }
 0x328   :  { %341 = vmatpush.bf16.msrb.mxu2 %v332_v28  ;;  %v311_v29 = vsel %vm309_vm3, %v305_v27, 0 }
 0x329   :  { %320 = vmatpush.bf16.msrb.mxu1 %v311_v29 }
 0x32b   :  { %1702 = vmatmul.msk.bf16.vlgmr.msrb.gmra.mxu2 %vm255_vm2, %v301_v30 }
 0x32c   :  { %1701 = vmatmul.msk.bf16.vlgmr.msrb.gmra.mxu1 %vm255_vm2, %v300_v31  ;;  %520 = vmatpush.bf16.msra.mxu2 %v1826_v12 }
 0x32d   :  { %426 = vmatpush.bf16.msra.mxu1 %v1824_v32  ;;  %v487_v32 = vperm.slane %v2280_v5, 2 }
 0x330   :  { %521 = vmatpush.bf16.msra.mxu2 %v1825_v17 }
 0x331   :  { %427 = vmatpush.bf16.msra.mxu1 %v1823_v42 }
 0x39b   :  { %v364_v33 = vpop.f32.mrf.mxu3 }
 0x3a1   :  { %v385_v34 = vpop.f32.mrf.mxu0 }
 0x3a2   :  { %v1865_v35 = vpack.i.bf16 %v385_v34, %v364_v33 }
 0x3a3   :  { %v366_v36 = vpop.f32.mrf.mxu3 }
 0x3a4   :  { %1866 = vrot.lane.b32.xlu2 %v1865_v35, %s2172_s28  ;;  %v490_v36 = vperm.slane %v2280_v5, 3 }
 0x3a9   :  { %v322_v37 = vpop.f32.mrf.mxu1  ;;  %v387_v38 = vpop.f32.mrf.mxu0 }
 0x3ae   :  { %v343_v39 = vpop.f32.mrf.mxu2 }
 0x3b1   :  { %v324_v40 = vpop.f32.mrf.mxu1 }
 0x3b6   :  { %v345_v41 = vpop.f32.mrf.mxu2 }
 0x3fe   :  { %v1867_v43 = vpop.permute.xlu2 %1866 }
 0x3ff   :  { %v1869_v44 = vunpack.i.h.bf16 %v1867_v43  ;;  %v1868_v45 = vunpack.i.l.bf16 %v1867_v43  ;;  %v1830_v43 = vld [vmem:[%s2835_s4 + $0x18] sm:$0xff] }
 0x400   :  { %588 = vmatpush.bf16.msra.mxu3 %v1830_v43 }
 0x401   :  { %v398_v46 = vsel %vm159_vm1, %v343_v39, %v1869_v44  ;;  %v397_v47 = vsel %vm159_vm1, %v322_v37, %v1868_v45  ;;  %v1829_v44 = vld [vmem:[%s2835_s4 + $0x10] sm:$0xff]  ;;  %v1828_v45 = vld [vmem:[%s2835_s4 + $0x8] sm:$0xff] }
 0x402   :  { %v399_v48 = vpack.c.bf16 %v398_v46, %v397_v47  ;;  %v1827_v46 = vld [vmem:[%s2835_s4] sm:$0xff]  ;;  %v498_v47 = vperm.slane %v2280_v5, 4 }
 0x404   :  { %1713 = vmatmul.msk.bf16.vlgmr.msra.gmra.mxu1 %vm124_vm0, %v399_v48  ;;  %589 = vmatpush.bf16.msra.mxu3 %v1829_v44 }
 0x408   :  { %590 = vmatpush.bf16.msra.mxu3 %v1828_v45 }
 0x40c   :  { %591 = vmatpush.bf16.msra.mxu3 %v1827_v46 }
 0x481   :  { %v429_v50 = vpop.f32.mrf.mxu1 }
 0x482   :  { %v430_v51 = vadd.f32 %v429_v50, %v404_v49 }
 0x484   :  { %v434_v52 = vadd.f32 %v430_v51, %v2273_v2 }
 0x486   :  { %v436_v53 = vsel %vm124_vm0, %v434_v52, 0.0 }
 0x487   :  { %437 = vadd.xlane.f32.xlu0 %v436_v53 }
 0x489   :  { %v431_v54 = vpop.f32.mrf.mxu1 }
 0x48a   :  { %v432_v55 = vadd.f32 %v431_v54, %v404_v49 }
 0x48c   :  { %v435_v56 = vadd.f32 %v432_v55, %v2275_v3 }
 0x48e   :  { %v439_v57 = vsel %vm124_vm0, %v435_v56, 0.0 }
 0x48f   :  { %440 = vadd.xlane.f32.xlu2 %v439_v57 }
 0x4fa   :  { %v438_v2 = vpop.xlane.xlu0 %437 }
 0x4fb   :  { %v449_v1 = vmul.f32 %v2344_v0, %v438_v2 }
 0x4fd   :  { %v451_v4 = vsub.f32 %v434_v52, %v449_v1 }
 0x4ff   :  { %v453_v6 = vmul.f32 %v451_v4, %v451_v4 }
 0x501   :  { %v455_v3 = vsel %vm124_vm0, %v453_v6, 0.0 }
 0x502   :  { %v441_v7 = vpop.xlane.xlu2 %440  ;;  %456 = vadd.xlane.f32.xlu1 %v455_v3 }
 0x503   :  { %v450_v8 = vmul.f32 %v2344_v0, %v441_v7 }
 0x505   :  { %v452_v9 = vsub.f32 %v435_v56, %v450_v8 }
 0x507   :  { %v454_v10 = vmul.f32 %v452_v9, %v452_v9 }
 0x509   :  { %v458_v11 = vsel %vm124_vm0, %v454_v10, 0.0 }
 0x50a   :  { %459 = vadd.xlane.f32.xlu0 %v458_v11 }
 0x575   :  { %v457_v13 = vpop.xlane.xlu1 %456 }
 0x576   :  { %v461_v15 = vmul.f32 %v457_v13, %v2344_v0 }
 0x578   :  { %v463_v18 = vadd.f32 1e-12, %v461_v15 }
 0x57a   :  { %1904 = vrsqrt.f32 %v463_v18  ;;  %vm471_vm6 = vweird.f32 %v463_v18 }
 0x57d   :  { %v460_v19 = vpop.xlane.xlu0 %459 }
 0x57e   :  { %v462_v20 = vmul.f32 %v460_v19, %v2344_v0 }
 0x580   :  { %v1905_v21 = vpop.eup %1904  ;;  %v464_v14 = vadd.f32 1e-12, %v462_v20 }
 0x581   :  { %v466_v16 = vmul.f32 %v1905_v21, %v463_v18  ;;  %vm472_vm5 = vweird.f32 %v1905_v21 }
 0x582   :  { %1906 = vrsqrt.f32 %v464_v14  ;;  %vm473_vm7 = vmor %vm471_vm6, %vm472_vm5  ;;  %vm481_vm9 = vweird.f32 %v464_v14 }
 0x583   :  { %v467_v22 = vmul.f32 %v1905_v21, %v466_v16 }
 0x585   :  { %v468_v23 = vmul.f32 0.5, %v467_v22 }
 0x587   :  { %v469_v24 = vsub.f32 1.5, %v468_v23 }
 0x588   :  { %v1907_v25 = vpop.eup %1906 }
 0x589   :  { %v470_v26 = vmul.f32 %v1905_v21, %v469_v24  ;;  %v476_v27 = vmul.f32 %v1907_v25, %v464_v14  ;;  %vm482_vm8 = vweird.f32 %v1907_v25 }
 0x58a   :  { %vm483_vm10 = vmor %vm481_vm9, %vm482_vm8 }
 0x58b   :  { %v477_v28 = vmul.f32 %v1907_v25, %v476_v27  ;;  %v474_v29 = vsel %vm473_vm7, %v1905_v21, %v470_v26 }
 0x58c   :  { %v485_v33 = vmul.f32 %v474_v29, %v451_v4 }
 0x58d   :  { %v478_v30 = vmul.f32 0.5, %v477_v28  ;;  %v1832_v28 = vld [vmem:[%s2832_s1 + $0x18] sm:$0xff] }
 0x58e   :  { %v488_v37 = vmul.f32 %v487_v32, %v485_v33  ;;  %680 = vmatpush.bf16.msrb.mxu0 %v1832_v28 }
 0x58f   :  { %v479_v31 = vsub.f32 1.5, %v478_v30 }
 0x590   :  { %v491_v40 = vadd.f32 %v490_v36, %v488_v37 }
 0x591   :  { %v480_v34 = vmul.f32 %v1907_v25, %v479_v31  ;;  %v1831_v31 = vld [vmem:[%s2832_s1 + $0x10] sm:$0xff]  ;;  %s1657_s1 = sshll.u32 %s2841_s10, 4  ;;  %s1658_s1 = int_to_ptr.hbm [resolvable:$true] %s1657_s1 }
 0x592   :  { %681 = vmatpush.bf16.msrb.mxu0 %v1831_v31 }
 0x593   :  { %v484_v35 = vsel %vm483_vm10, %v1907_v25, %v480_v34 }
 0x594   :  { %v486_v38 = vmul.f32 %v484_v35, %v452_v9  ;;  %v555_v9 = vperm.slane %v2280_v5, 5 }
 0x596   :  { %v489_v39 = vmul.f32 %v487_v32, %v486_v38 }
 0x598   :  { %v492_v41 = vadd.f32 %v490_v36, %v489_v39 }
 0x59a   :  { %v493_v42 = vpack.c.bf16 %v492_v41, %v491_v40 }
 0x59c   :  { %1722 = vmatmul.msk.bf16.vlgmr.msra.gmra.mxu2 %vm124_vm0, %v493_v42 }
 0x61f   :  { %v523_v48 = vpop.f32.mrf.mxu2 }
 0x620   :  { %v524_v49 = vadd.f32 %v523_v48, %v498_v47  ;;  %v644_v48 = vperm.slane %v2280_v5, 6 }
 0x622   :  { %v530_v50 = vmul.f32 0.044715, %v524_v49  ;;  %v528_v1 = vmul.f32 0.5, %v524_v49 }
 0x624   :  { %v532_v51 = vmul.f32 %v530_v50, %v524_v49 }
 0x626   :  { %v534_v52 = vmul.f32 %v532_v51, %v524_v49 }
 0x627   :  { %v525_v53 = vpop.f32.mrf.mxu2 }
 0x628   :  { %v536_v54 = vadd.f32 %v534_v52, %v524_v49  ;;  %v526_v55 = vadd.f32 %v525_v53, %v498_v47  ;;  %v647_v52 = vperm.slane %v2280_v5, 7 }
 0x62a   :  { %v531_v56 = vmul.f32 0.044715, %v526_v55  ;;  %v538_v57 = vmul.f32 0.7978846, %v536_v54  ;;  %v529_v4 = vmul.f32 0.5, %v526_v55 }
 0x62c   :  { %v533_v58 = vmul.f32 %v531_v56, %v526_v55  ;;  %1908 = vtanh.f32 %v538_v57 }
 0x62e   :  { %v535_v59 = vmul.f32 %v533_v58, %v526_v55 }
 0x630   :  { %v537_v60 = vadd.f32 %v535_v59, %v526_v55  ;;  %v2399_v59 = vld [vmem:[#allocation5 + $0x8] sm:$0xff] }
 0x632   :  { %v539_v61 = vmul.f32 0.7978846, %v537_v60  ;;  %v1909_v62 = vpop.eup %1908  ;;  %v658_v60 = vperm.slane %v2399_v59, 0 }
 0x633   :  { %v542_v63 = vadd.f32 1.0, %v1909_v62 }
 0x634   :  { %1910 = vtanh.f32 %v539_v61 }
 0x635   :  { %v544_v3 = vmul.f32 %v542_v63, %v528_v1 }
 0x63a   :  { %v1911_v2 = vpop.eup %1910 }
 0x63b   :  { %v543_v6 = vadd.f32 1.0, %v1911_v2 }
 0x63d   :  { %v545_v7 = vmul.f32 %v543_v6, %v529_v4 }
 0x63f   :  { %v546_v8 = vpack.c.bf16 %v545_v7, %v544_v3 }
 0x641   :  { %1739 = vmatmul.msk.bf16.vlgmr.msra.gmra.mxu3 %vm580_vm11, %v546_v8 }
 0x6c4   :  { %v593_v10 = vpop.f32.mrf.mxu3 }
 0x6c5   :  { %v594_v11 = vadd.f32 %v593_v10, %v555_v9 }
 0x6c7   :  { %v598_v12 = vadd.f32 %v594_v11, %v491_v40 }
 0x6c9   :  { %v600_v13 = vsel %vm124_vm0, %v598_v12, 0.0 }
 0x6ca   :  { %601 = vadd.xlane.f32.xlu2 %v600_v13 }
 0x6cc   :  { %v595_v15 = vpop.f32.mrf.mxu3 }
 0x6cd   :  { %v596_v17 = vadd.f32 %v595_v15, %v555_v9 }
 0x6cf   :  { %v599_v18 = vadd.f32 %v596_v17, %v492_v41 }
 0x6d1   :  { %v603_v19 = vsel %vm124_vm0, %v599_v18, 0.0 }
 0x6d2   :  { %604 = vadd.xlane.f32.xlu0 %v603_v19 }
 0x73d   :  { %v602_v20 = vpop.xlane.xlu2 %601 }
 0x73e   :  { %v606_v21 = vmul.f32 %v602_v20, %v2344_v0 }
 0x740   :  { %v608_v14 = vsub.f32 %v598_v12, %v606_v21 }
 0x742   :  { %v610_v16 = vmul.f32 %v608_v14, %v608_v14 }
 0x744   :  { %v612_v22 = vsel %vm124_vm0, %v610_v16, 0.0 }
 0x745   :  { %v605_v23 = vpop.xlane.xlu0 %604  ;;  %613 = vadd.xlane.f32.xlu2 %v612_v22 }
 0x746   :  { %v607_v24 = vmul.f32 %v605_v23, %v2344_v0 }
 0x748   :  { %v609_v25 = vsub.f32 %v599_v18, %v607_v24 }
 0x74a   :  { %v611_v26 = vmul.f32 %v609_v25, %v609_v25 }
 0x74c   :  { %v615_v27 = vsel %vm124_vm0, %v611_v26, 0.0 }
 0x74d   :  { %616 = vadd.xlane.f32.xlu1 %v615_v27 }
 0x7b8   :  { %v614_v29 = vpop.xlane.xlu2 %613 }
 0x7b9   :  { %v618_v30 = vmul.f32 %v614_v29, %v2344_v0 }
 0x7bb   :  { %v620_v32 = vadd.f32 1e-12, %v618_v30 }
 0x7bd   :  { %1912 = vrsqrt.f32 %v620_v32  ;;  %vm628_vm13 = vweird.f32 %v620_v32 }
 0x7c0   :  { %v617_v33 = vpop.xlane.xlu1 %616 }
 0x7c1   :  { %v619_v34 = vmul.f32 %v617_v33, %v2344_v0 }
 0x7c3   :  { %v1913_v35 = vpop.eup %1912  ;;  %v621_v36 = vadd.f32 1e-12, %v619_v34 }
 0x7c4   :  { %v623_v37 = vmul.f32 %v1913_v35, %v620_v32  ;;  %vm629_vm12 = vweird.f32 %v1913_v35 }
 0x7c5   :  { %1914 = vrsqrt.f32 %v621_v36  ;;  %vm630_vm14 = vmor %vm628_vm13, %vm629_vm12  ;;  %vm638_vm4 = vweird.f32 %v621_v36 }
 0x7c6   :  { %v624_v38 = vmul.f32 %v1913_v35, %v623_v37 }
 0x7c8   :  { %v625_v39 = vmul.f32 0.5, %v624_v38 }
 0x7ca   :  { %v626_v40 = vsub.f32 1.5, %v625_v39 }
 0x7cb   :  { %v1915_v41 = vpop.eup %1914 }
 0x7cc   :  { %v627_v42 = vmul.f32 %v1913_v35, %v626_v40  ;;  %v633_v43 = vmul.f32 %v1915_v41, %v621_v36  ;;  %vm639_vm15 = vweird.f32 %v1915_v41 }
 0x7cd   :  { %vm640_vm5 = vmor %vm638_vm4, %vm639_vm15  ;;  %vm1354_vm15 = vcmask 1041408  }
 0x7ce   :  { %v634_v44 = vmul.f32 %v1915_v41, %v633_v43  ;;  %v631_v45 = vsel %vm630_vm14, %v1913_v35, %v627_v42 }
 0x7cf   :  { %v642_v49 = vmul.f32 %v631_v45, %v608_v14 }
 0x7d0   :  { %v635_v46 = vmul.f32 0.5, %v634_v44 }
 0x7d1   :  { %v645_v53 = vmul.f32 %v644_v48, %v642_v49 }
 0x7d2   :  { %v636_v47 = vsub.f32 1.5, %v635_v46 }
 0x7d3   :  { %v2392_v56 = vadd.f32 %v647_v52, %v645_v53 }
 0x7d4   :  { %v637_v50 = vmul.f32 %v1915_v41, %v636_v47 }
 0x7d6   :  { %v641_v51 = vsel %vm640_vm5, %v1915_v41, %v637_v50 }
 0x7d7   :  { %v643_v54 = vmul.f32 %v641_v51, %v609_v25 }
 0x7d9   :  { %v646_v55 = vmul.f32 %v644_v48, %v643_v54 }
 0x7db   :  { %v2394_v57 = vadd.f32 %v647_v52, %v646_v55 }
 0x7dd   :  { %v652_v58 = vpack.c.bf16 %v2394_v57, %v2392_v56 }
 0x7df   :  { %1752 = vmatmul.msk.bf16.vlgmr.msrb.gmra.mxu0 %vm124_vm0, %v652_v58 }
 0x85c   :  { %v683_v61 = vpop.f32.mrf.mxu0 }
 0x85d   :  { %v684_v62 = vadd.f32 %v683_v61, %v658_v60 }
 0x85f   :  { %690 = vrot.lane.b32.xlu0 %v684_v62, %s2170_s22  ;;  %v696_v8 = vpack.c.bf16 %v684_v62, %v684_v62 }
 0x861   :  { %v701_v12 = vunpack.c.l.b16 %v696_v8 }
 0x863   :  { %v702_v13 = vpack.c.b16 %v701_v12, %v701_v12 }
 0x864   :  { %v685_v5 = vpop.f32.mrf.mxu0 }
 0x865   :  { %v686_v63 = vadd.f32 %v685_v5, %v658_v60 }
 0x867   :  { %v697_v2 = vpack.c.bf16 %v686_v63, %v686_v63  ;;  %692 = vrot.lane.b32.xlu2 %v686_v63, %s2170_s22  ;;  %s2183_s22 = smov [#allocation11]  }
 0x869   :  { %v725_v1 = vunpack.c.l.b16 %v697_v2 }
 0x86b   :  { %v2404_v4 = vpack.c.b16 %v725_v1, %v725_v1 }
 0x86f   :  { %727 = vrot.lane.b32.xlu2 %v2404_v4, %s2171_s23 }
 0x8c1   :  { %v693_v6 = vpop.permute.xlu2 %692 }
 0x8c2   :  { %v699_v3 = vpack.c.bf16 %v693_v6, %v693_v6 }
 0x8c4   :  { %v773_v7 = vunpack.c.l.b16 %v699_v3 }
 0x8c6   :  { %v2408_v9 = vpack.c.b16 %v773_v7, %v773_v7 }
 0x8c8   :  { %775 = vrot.lane.b32.xlu0 %v2408_v9, %s2171_s23 }
 0x8c9   :  { %v728_v10 = vpop.permute.xlu2 %727 }
 0x8ca   :  { %v733_v11 = vsel %vm159_vm1, %v728_v10, 0 }
 0x8cb   :  { %742 = vmatpush.bf16.xpose.msrb.mxu2 %v733_v11 }
 0x8d0   :  { %703 = vrot.lane.b32.xlu0 %v702_v13, %s2171_s23 }
 0x8d1   :  { %v691_v15 = vpop.permute.xlu0 %690 }
 0x8d2   :  { %v698_v17 = vpack.c.bf16 %v691_v15, %v691_v15  ;;  %1754 = vmatmul.msk.bf16.vlgmr.msrb.gmra.mxu2 %vm159_vm1, %v697_v2 }
 0x8d4   :  { %v749_v18 = vunpack.c.l.b16 %v698_v17 }
 0x8d6   :  { %v750_v19 = vpack.c.b16 %v749_v18, %v749_v18 }
 0x8d8   :  { %751 = vrot.lane.b32.xlu1 %v750_v19, %s2171_s23  ;;  %s1669_s23 = sshll.u32 %s2183_s22, 4  ;;  %s1670_s23 = int_to_ptr.vmem [resolvable:$true] %s1669_s23 }
 0x93a   :  { %v776_v20 = vpop.permute.xlu0 %775 }
 0x93b   :  { %v781_v21 = vsel %vm159_vm1, %v776_v20, 0 }
 0x93c   :  { %790 = vmatpush.bf16.xpose.msra.mxu0 %v781_v21 }
 0x942   :  { %v704_v14 = vpop.permute.xlu0 %703 }
 0x943   :  { %v709_v16 = vsel %vm159_vm1, %v704_v14, 0  ;;  %1756 = vmatmul.msk.bf16.vlgmr.msra.gmra.mxu0 %vm159_vm1, %v699_v3 }
 0x944   :  { %718 = vmatpush.bf16.xpose.msrb.mxu1 %v709_v16 }
 0x94a   :  { %v752_v22 = vpop.permute.xlu1 %751 }
 0x94b   :  { %v757_v23 = vsel %vm159_vm1, %v752_v22, 0  ;;  %1753 = vmatmul.msk.bf16.vlgmr.msrb.gmra.mxu1 %vm159_vm1, %v696_v8 }
 0x94c   :  { %766 = vmatpush.bf16.xpose.msrb.mxu3 %v757_v23 }
 0x953   :  { %1755 = vmatmul.msk.bf16.vlgmr.msrb.gmra.mxu3 %vm159_vm1, %v698_v17 }
 0x955   :  { %v744_v24 = vpop.f32.mrf.mxu2 }
 0x956   :  { %v797_v25 = vmul.f32 0.25, %v744_v24 }
 0x958   :  { %v803_v26 = vsel %vm255_vm2, %v797_v25, -inf }
 0x959   :  { %804 = vmax.xlane.f32.xlu0 %v803_v26  ;;  %v1834_v26 = vld [vmem:[%s2833_s2 + $0x18] sm:$0xff] }
 0x95d   :  { %v746_v27 = vpop.f32.mrf.mxu2 }
 0x9c0   :  { %v792_v28 = vpop.f32.mrf.mxu0 }
 0x9c1   :  { %v799_v29 = vmul.f32 0.25, %v792_v28 }
 0x9c3   :  { %v809_v30 = vsel %vm255_vm2, %v799_v29, -inf }
 0x9c4   :  { %810 = vmax.xlane.f32.xlu2 %v809_v30 }
 0x9c8   :  { %v720_v31 = vpop.f32.mrf.mxu1  ;;  %v794_v32 = vpop.f32.mrf.mxu0 }
 0x9c9   :  { %v796_v42 = vmul.f32 0.25, %v720_v31 }
 0x9cb   :  { %v800_v44 = vsel %vm255_vm2, %v796_v42, -inf }
 0x9cc   :  { %v805_v33 = vpop.xlane.xlu0 %804 }
 0x9cd   :  { %v813_v34 = vsub.f32 %v797_v25, %v805_v33 }
 0x9cf   :  { %v818_v35 = vmul.f32 1.442695, %v813_v34  ;;  %v1833_v34 = vld [vmem:[%s2833_s2 + $0x10] sm:$0xff] }
 0x9d0   :  { %v722_v36 = vpop.f32.mrf.mxu1 }
 0x9d1   :  { %1916 = vpow2.f32 %v818_v35 }
 0x9d6   :  { %v768_v37 = vpop.f32.mrf.mxu3 }
 0x9d7   :  { %v2424_v38 = vpop.eup %1916  ;;  %v798_v39 = vmul.f32 0.25, %v768_v37 }
 0x9d8   :  { %v827_v40 = vsel %vm255_vm2, %v2424_v38, 0.0 }
 0x9d9   :  { %828 = vadd.xlane.f32.xlu0 %v827_v40  ;;  %v806_v41 = vsel %vm255_vm2, %v798_v39, -inf }
 0x9da   :  { %807 = vmax.xlane.f32.xlu1 %v806_v41  ;;  %v948_v41 = vperm.slane %v2399_v59, 1 }
 0x9de   :  { %v770_v43 = vpop.f32.mrf.mxu3 }
 0x9e2   :  { %801 = vmax.xlane.f32.xlu1 %v800_v44 }
 0x9fb   :  { %890 = vrot.lane.b32.xlu1 %v750_v19, %s2167_s16 }
 0xa03   :  { %848 = vrot.lane.b32.xlu1 %v702_v13, %s2167_s16 }
 0xa37   :  { %v811_v48 = vpop.xlane.xlu2 %810 }
 0xa38   :  { %v815_v52 = vsub.f32 %v799_v29, %v811_v48 }
 0xa3a   :  { %v822_v55 = vmul.f32 1.442695, %v815_v52 }
 0xa4c   :  { %v829_v6 = vpop.xlane.xlu0 %828 }
 0xa4d   :  { %v808_v45 = vpop.xlane.xlu1 %807 }
 0xa4e   :  { %v814_v46 = vsub.f32 %v798_v39, %v808_v45 }
 0xa50   :  { %v820_v47 = vmul.f32 1.442695, %v814_v46 }
 0xa52   :  { %1918 = vpow2.f32 %v820_v47 }
 0xa55   :  { %v802_v49 = vpop.xlane.xlu1 %801 }
 0xa56   :  { %v812_v50 = vsub.f32 %v796_v42, %v802_v49 }
 0xa58   :  { %v1919_v51 = vpop.eup %1918  ;;  %v816_v53 = vmul.f32 1.442695, %v812_v50 }
 0xa59   :  { %v830_v54 = vsel %vm255_vm2, %v1919_v51, 0.0 }
 0xa5a   :  { %1920 = vpow2.f32 %v816_v53  ;;  %831 = vadd.xlane.f32.xlu2 %v830_v54 }
 0xa5b   :  { %1922 = vpow2.f32 %v822_v55 }
 0xa60   :  { %v1921_v58 = vpop.eup %1920 }
 0xa61   :  { %v824_v60 = vsel %vm255_vm2, %v1921_v58, 0.0  ;;  %v1923_v61 = vpop.eup %1922 }
 0xa62   :  { %825 = vadd.xlane.f32.xlu0 %v824_v60  ;;  %v833_v62 = vsel %vm255_vm2, %v1923_v61, 0.0 }
 0xa6a   :  { %834 = vadd.xlane.f32.xlu0 %v833_v62 }
 0xa6d   :  { %v891_v5 = vpop.permute.xlu1 %890 }
 0xa6e   :  { %v896_v63 = vsel %vm309_vm3, %v891_v5, 0 }
 0xa6f   :  { %905 = vmatpush.bf16.msra.mxu3 %v896_v63  ;;  %v1835_v63 = vld [vmem:[%s2834_s3 + $0x10] sm:$0xff] }
 0xa72   :  { %911 = vrot.lane.b32.xlu2 %v2408_v9, %s2167_s16 }
 0xa75   :  { %v849_v2 = vpop.permute.xlu1 %848 }
 0xa76   :  { %v854_v1 = vsel %vm309_vm3, %v849_v2, 0 }
 0xa77   :  { %863 = vmatpush.bf16.msra.mxu1 %v854_v1 }
 0xa7b   :  { %970 = vmatpush.bf16.msrb.mxu1 %v1834_v26 }
 0xa7e   :  { %869 = vrot.lane.b32.xlu0 %v2404_v4, %s2167_s16 }
 0xa7f   :  { %971 = vmatpush.bf16.msrb.mxu1 %v1833_v34 }
 0xacd   :  { %v832_v3 = vpop.xlane.xlu2 %831 }
 0xace   :  { %1924 = vrcp.f32 %v832_v3 }
 0xad4   :  { %v1925_v7 = vpop.eup %1924 }
 0xad5   :  { %v842_v8 = vmul.f32 %v1925_v7, %v1919_v51  ;;  %v912_v10 = vpop.permute.xlu2 %911  ;;  %v826_v11 = vpop.xlane.xlu0 %825 }
 0xad6   :  { %v917_v12 = vsel %vm309_vm3, %v912_v10, 0  ;;  %1926 = vrcp.f32 %v826_v11 }
 0xad7   :  { %v846_v13 = vpack.c.bf16 %v842_v8, %v842_v8  ;;  %926 = vmatpush.bf16.msrb.mxu0 %v917_v12 }
 0xad9   :  { %1759 = vmatmul.msk.bf16.vlgmr.msra.gmra.mxu3 %vm255_vm2, %v846_v13 }
 0xadc   :  { %v1927_v9 = vpop.eup %1926 }
 0xadd   :  { %v840_v15 = vmul.f32 %v1927_v9, %v1921_v58  ;;  %v835_v17 = vpop.xlane.xlu0 %834 }
 0xade   :  { %1928 = vrcp.f32 %v835_v17 }
 0xadf   :  { %v844_v18 = vpack.c.bf16 %v840_v15, %v840_v15  ;;  %1930 = vrcp.f32 %v829_v6 }
 0xae1   :  { %1757 = vmatmul.msk.bf16.vlgmr.msra.gmra.mxu1 %vm255_vm2, %v844_v18 }
 0xae4   :  { %v1929_v4 = vpop.eup %1928 }
 0xae5   :  { %v843_v19 = vmul.f32 %v1929_v4, %v1923_v61  ;;  %v1931_v21 = vpop.eup %1930 }
 0xae6   :  { %v841_v14 = vmul.f32 %v1931_v21, %v2424_v38 }
 0xae7   :  { %v847_v20 = vpack.c.bf16 %v843_v19, %v843_v19 }
 0xae8   :  { %v845_v23 = vpack.c.bf16 %v841_v14, %v841_v14 }
 0xae9   :  { %1760 = vmatmul.msk.bf16.vlgmr.msrb.gmra.mxu0 %vm255_vm2, %v847_v20  ;;  %v1024_v20 = vperm.slane %v2399_v59, 2 }
 0xaf0   :  { %v870_v16 = vpop.permute.xlu0 %869 }
 0xaf1   :  { %v875_v22 = vsel %vm309_vm3, %v870_v16, 0 }
 0xaf2   :  { %884 = vmatpush.bf16.msra.mxu2 %v875_v22  ;;  %v1027_v22 = vperm.slane %v2399_v59, 3 }
 0xaf5   :  { %1758 = vmatmul.msk.bf16.vlgmr.msra.gmra.mxu2 %vm255_vm2, %v845_v23 }
 0xb5c   :  { %v907_v24 = vpop.f32.mrf.mxu3 }
 0xb5e   :  { %v865_v25 = vpop.f32.mrf.mxu1 }
 0xb64   :  { %v909_v27 = vpop.f32.mrf.mxu3 }
 0xb66   :  { %v867_v28 = vpop.f32.mrf.mxu1  ;;  %v928_v29 = vpop.f32.mrf.mxu0 }
 0xb67   :  { %v1870_v30 = vpack.i.bf16 %v928_v29, %v907_v24  ;;  %v1840_v29 = vld [vmem:[%s2835_s4 + $0x38] sm:$0xff] }
 0xb68   :  { %1126 = vmatpush.bf16.msrb.mxu3 %v1840_v29  ;;  %v2550_v29 = vld [vmem:[#allocation8 + $0x68] sm:$0xff] }
 0xb69   :  { %1871 = vrot.lane.b32.xlu2 %v1870_v30, %s2172_s28  ;;  %v1839_v30 = vld [vmem:[%s2835_s4 + $0x30] sm:$0xff] }
 0xb6c   :  { %1127 = vmatpush.bf16.msrb.mxu3 %v1839_v30  ;;  %v1842_v30 = vld [vmem:[#allocation7 + $0x8] sm:$0xff] }
 0xb6d   :  { %1216 = vmatpush.bf16.msra.mxu0 %v1842_v30 }
 0xb6e   :  { %v930_v31 = vpop.f32.mrf.mxu0 }
 0xb6f   :  { %v1838_v31 = vld [vmem:[%s2835_s4 + $0x28] sm:$0xff] }
 0xb70   :  { %1128 = vmatpush.bf16.msrb.mxu3 %v1838_v31 }
 0xb78   :  { %v886_v32 = vpop.f32.mrf.mxu2 }
 0xb80   :  { %v888_v33 = vpop.f32.mrf.mxu2 }
 0xb81   :  { %v1036_v33 = vperm.slane %v2399_v59, 4 }
 0xbc3   :  { %v1872_v35 = vpop.permute.xlu2 %1871 }
 0xbc4   :  { %v1874_v36 = vunpack.i.h.bf16 %v1872_v35  ;;  %v1873_v37 = vunpack.i.l.bf16 %v1872_v35 }
 0xbc6   :  { %v940_v38 = vsel %vm159_vm1, %v865_v25, %v1873_v37  ;;  %v941_v39 = vsel %vm159_vm1, %v886_v32, %v1874_v36  ;;  %v1837_v32 = vld [vmem:[%s2835_s4 + $0x20] sm:$0xff] }
 0xbc7   :  { %v942_v40 = vpack.c.bf16 %v941_v39, %v940_v38  ;;  %1129 = vmatpush.bf16.msrb.mxu3 %v1837_v32 }
 0xbc9   :  { %1773 = vmatmul.msk.bf16.vlgmr.msrb.gmra.mxu1 %vm124_vm0, %v942_v40 }
 0xc46   :  { %v973_v42 = vpop.f32.mrf.mxu1 }
 0xc47   :  { %v974_v43 = vadd.f32 %v973_v42, %v948_v41 }
 0xc49   :  { %v978_v44 = vadd.f32 %v974_v43, %v2392_v56 }
 0xc4b   :  { %v980_v45 = vsel %vm124_vm0, %v978_v44, 0.0 }
 0xc4c   :  { %981 = vadd.xlane.f32.xlu1 %v980_v45 }
 0xc4e   :  { %v975_v46 = vpop.f32.mrf.mxu1 }
 0xc4f   :  { %v976_v47 = vadd.f32 %v975_v46, %v948_v41 }
 0xc51   :  { %v979_v48 = vadd.f32 %v976_v47, %v2394_v57  ;;  %v1836_v57 = vld [vmem:[%s2834_s3 + $0x18] sm:$0xff] }
 0xc52   :  { %1058 = vmatpush.bf16.msrb.mxu2 %v1836_v57 }
 0xc53   :  { %v983_v49 = vsel %vm124_vm0, %v979_v48, 0.0 }
 0xc54   :  { %984 = vadd.xlane.f32.xlu2 %v983_v49 }
 0xc56   :  { %1059 = vmatpush.bf16.msrb.mxu2 %v1835_v63 }
 0xcbf   :  { %v982_v50 = vpop.xlane.xlu1 %981 }
 0xcc0   :  { %v986_v51 = vmul.f32 %v982_v50, %v2344_v0 }
 0xcc2   :  { %v988_v52 = vsub.f32 %v978_v44, %v986_v51 }
 0xcc4   :  { %v990_v53 = vmul.f32 %v988_v52, %v988_v52 }
 0xcc6   :  { %v992_v54 = vsel %vm124_vm0, %v990_v53, 0.0 }
 0xcc7   :  { %v985_v55 = vpop.xlane.xlu2 %984  ;;  %993 = vadd.xlane.f32.xlu0 %v992_v54 }
 0xcc8   :  { %v987_v56 = vmul.f32 %v985_v55, %v2344_v0 }
 0xcca   :  { %v989_v58 = vsub.f32 %v979_v48, %v987_v56 }
 0xccc   :  { %v991_v60 = vmul.f32 %v989_v58, %v989_v58 }
 0xcce   :  { %v995_v61 = vsel %vm124_vm0, %v991_v60, 0.0 }
 0xccf   :  { %996 = vadd.xlane.f32.xlu1 %v995_v61 }
 0xd3a   :  { %v994_v62 = vpop.xlane.xlu0 %993 }
 0xd3b   :  { %v998_v5 = vmul.f32 %v994_v62, %v2344_v0 }
 0xd3d   :  { %v1000_v2 = vadd.f32 1e-12, %v998_v5 }
 0xd3f   :  { %1932 = vrsqrt.f32 %v1000_v2  ;;  %vm1008_vm2 = vweird.f32 %v1000_v2 }
 0xd42   :  { %v997_v1 = vpop.xlane.xlu1 %996 }
 0xd43   :  { %v999_v6 = vmul.f32 %v997_v1, %v2344_v0 }
 0xd45   :  { %v1933_v3 = vpop.eup %1932  ;;  %v1001_v7 = vadd.f32 1e-12, %v999_v6 }
 0xd46   :  { %v1003_v8 = vmul.f32 %v1933_v3, %v1000_v2  ;;  %vm1009_vm1 = vweird.f32 %v1933_v3 }
 0xd47   :  { %1934 = vrsqrt.f32 %v1001_v7  ;;  %vm1010_vm3 = vmor %vm1008_vm2, %vm1009_vm1  ;;  %vm1018_vm7 = vweird.f32 %v1001_v7 }
 0xd48   :  { %v1004_v10 = vmul.f32 %v1933_v3, %v1003_v8 }
 0xd4a   :  { %v1005_v11 = vmul.f32 0.5, %v1004_v10 }
 0xd4c   :  { %v1006_v12 = vsub.f32 1.5, %v1005_v11 }
 0xd4d   :  { %v1935_v13 = vpop.eup %1934 }
 0xd4e   :  { %v1007_v9 = vmul.f32 %v1933_v3, %v1006_v12  ;;  %v1013_v15 = vmul.f32 %v1935_v13, %v1001_v7  ;;  %vm1019_vm6 = vweird.f32 %v1935_v13 }
 0xd4f   :  { %vm1020_vm8 = vmor %vm1018_vm7, %vm1019_vm6 }
 0xd50   :  { %v1014_v17 = vmul.f32 %v1935_v13, %v1013_v15  ;;  %v1011_v18 = vsel %vm1010_vm3, %v1933_v3, %v1007_v9 }
 0xd51   :  { %v1022_v21 = vmul.f32 %v1011_v18, %v988_v52  ;;  %v2510_v18 = vld [vmem:[#allocation8 + $0x18] sm:$0xff] }
 0xd52   :  { %v1015_v4 = vmul.f32 0.5, %v1014_v17  ;;  %v2507_v17 = vld [vmem:[#allocation8] sm:$0xff] }
 0xd53   :  { %v1025_v23 = vmul.f32 %v1024_v20, %v1022_v21  ;;  %v2521_v21 = vld [vmem:[#allocation8 + $0x28] sm:$0xff] }
 0xd54   :  { %v1016_v19 = vsub.f32 1.5, %v1015_v4  ;;  %v2512_v4 = vld [vmem:[#allocation8 + $0x10] sm:$0xff] }
 0xd55   :  { %v1028_v26 = vadd.f32 %v1027_v22, %v1025_v23  ;;  %v2532_v23 = vld [vmem:[#allocation8 + $0x38] sm:$0xff] }
 0xd56   :  { %v1017_v14 = vmul.f32 %v1935_v13, %v1016_v19  ;;  %v2514_v19 = vld [vmem:[#allocation8 + $0x8] sm:$0xff] }
 0xd58   :  { %v1021_v16 = vsel %vm1020_vm8, %v1935_v13, %v1017_v14  ;;  %v2523_v14 = vld [vmem:[#allocation8 + $0x20] sm:$0xff] }
 0xd59   :  { %v1023_v24 = vmul.f32 %v1021_v16, %v989_v58  ;;  %v1094_v58 = vperm.slane %v2399_v59, 5  ;;  %v2528_v16 = vld [vmem:[#allocation8 + $0x48] sm:$0xff] }
 0xd5b   :  { %v1026_v25 = vmul.f32 %v1024_v20, %v1023_v24  ;;  %v2519_v20 = vld [vmem:[#allocation8 + $0x30] sm:$0xff]  ;;  %v2537_v24 = vld [vmem:[#allocation8 + $0x60] sm:$0xff] }
 0xd5d   :  { %v1029_v27 = vadd.f32 %v1027_v22, %v1026_v25  ;;  %v2530_v22 = vld [vmem:[#allocation8 + $0x40] sm:$0xff]  ;;  %v2539_v25 = vld [vmem:[#allocation8 + $0x58] sm:$0xff] }
 0xd5f   :  { %v1030_v28 = vpack.c.bf16 %v1029_v27, %v1028_v26 }
 0xd61   :  { %1786 = vmatmul.msk.bf16.vlgmr.msrb.gmra.mxu2 %vm124_vm0, %v1030_v28  ;;  %v2548_v28 = vld [vmem:[#allocation8 + $0x70] sm:$0xff] }
 0xde4   :  { %v1061_v34 = vpop.f32.mrf.mxu2 }
 0xde5   :  { %v1062_v35 = vadd.f32 %v1061_v34, %v1036_v33 }
 0xde7   :  { %v1068_v36 = vmul.f32 0.044715, %v1062_v35  ;;  %v1066_v51 = vmul.f32 0.5, %v1062_v35 }
 0xde9   :  { %v1070_v37 = vmul.f32 %v1068_v36, %v1062_v35 }
 0xdeb   :  { %v1072_v38 = vmul.f32 %v1070_v37, %v1062_v35 }
 0xdec   :  { %v1063_v39 = vpop.f32.mrf.mxu2 }
 0xded   :  { %v1074_v40 = vadd.f32 %v1072_v38, %v1062_v35  ;;  %v1064_v41 = vadd.f32 %v1063_v39, %v1036_v33  ;;  %v1841_v33 = vld [vmem:[#allocation7] sm:$0xff] }
 0xdee   :  { %1217 = vmatpush.bf16.msra.mxu0 %v1841_v33 }
 0xdef   :  { %v1069_v42 = vmul.f32 0.044715, %v1064_v41  ;;  %v1076_v43 = vmul.f32 0.7978846, %v1074_v40  ;;  %v1067_v52 = vmul.f32 0.5, %v1064_v41 }
 0xdf1   :  { %v1071_v44 = vmul.f32 %v1069_v42, %v1064_v41  ;;  %1936 = vtanh.f32 %v1076_v43 }
 0xdf3   :  { %v1073_v45 = vmul.f32 %v1071_v44, %v1064_v41 }
 0xdf5   :  { %v1075_v46 = vadd.f32 %v1073_v45, %v1064_v41 }
 0xdf7   :  { %v1077_v47 = vmul.f32 0.7978846, %v1075_v46  ;;  %v1937_v48 = vpop.eup %1936 }
 0xdf8   :  { %v1080_v49 = vadd.f32 1.0, %v1937_v48 }
 0xdf9   :  { %1938 = vtanh.f32 %v1077_v47 }
 0xdfa   :  { %v1082_v54 = vmul.f32 %v1080_v49, %v1066_v51 }
 0xdff   :  { %v1939_v50 = vpop.eup %1938 }
 0xe00   :  { %v1081_v53 = vadd.f32 1.0, %v1939_v50 }
 0xe02   :  { %v1083_v55 = vmul.f32 %v1081_v53, %v1067_v52  ;;  %v1185_v53 = vperm.slane %v2399_v59, 7 }
 0xe04   :  { %v1084_v56 = vpack.c.bf16 %v1083_v55, %v1082_v54 }
 0xe06   :  { %1811 = vmatmul.msk.bf16.vlgmr.msrb.gmra.mxu3 %vm580_vm11, %v1084_v56 }
 0xe89   :  { %v1131_v60 = vpop.f32.mrf.mxu3 }
 0xe8a   :  { %v1132_v61 = vadd.f32 %v1131_v60, %v1094_v58 }
 0xe8c   :  { %v1136_v57 = vadd.f32 %v1132_v61, %v1028_v26  ;;  %v2541_v26 = vld [vmem:[#allocation8 + $0x50] sm:$0xff] }
 0xe8e   :  { %v1138_v62 = vsel %vm124_vm0, %v1136_v57, 0.0 }
 0xe8f   :  { %1139 = vadd.xlane.f32.xlu2 %v1138_v62 }
 0xe91   :  { %v1133_v5 = vpop.f32.mrf.mxu3 }
 0xe92   :  { %v1134_v63 = vadd.f32 %v1133_v5, %v1094_v58 }
 0xe94   :  { %v1137_v2 = vadd.f32 %v1134_v63, %v1029_v27  ;;  %v2546_v27 = vld [vmem:[#allocation8 + $0x78] sm:$0xff] }
 0xe96   :  { %v1141_v1 = vsel %vm124_vm0, %v1137_v2, 0.0 }
 0xe97   :  { %1142 = vadd.xlane.f32.xlu1 %v1141_v1 }
 0xe9f   :  { %1244 = vmax.xlane.f32.xlu1 %v2507_v17 }
 0xea7   :  { %1250 = vmax.xlane.f32.xlu1 %v2510_v18 }
 0xeaf   :  { %1256 = vmax.xlane.f32.xlu1 %v2519_v20 }
 0xeb7   :  { %1262 = vmax.xlane.f32.xlu1 %v2528_v16 }
 0xebf   :  { %1268 = vmax.xlane.f32.xlu1 %v2537_v24 }
 0xec7   :  { %1274 = vmax.xlane.f32.xlu1 %v2546_v27 }
 0xf02   :  { %v1140_v6 = vpop.xlane.xlu2 %1139 }
 0xf03   :  { %v1144_v3 = vmul.f32 %v1140_v6, %v2344_v0 }
 0xf05   :  { %v2496_v7 = vsub.f32 %v1136_v57, %v1144_v3 }
 0xf07   :  { %v1148_v8 = vmul.f32 %v2496_v7, %v2496_v7 }
 0xf09   :  { %v1150_v10 = vsel %vm124_vm0, %v1148_v8, 0.0 }
 0xf0a   :  { %v1143_v11 = vpop.xlane.xlu1 %1142  ;;  %1151 = vadd.xlane.f32.xlu0 %v1150_v10 }
 0xf0b   :  { %v1145_v12 = vmul.f32 %v1143_v11, %v2344_v0 }
 0xf0d   :  { %v2502_v13 = vsub.f32 %v1137_v2, %v1145_v12 }
 0xf0f   :  { %v1149_v9 = vmul.f32 %v2502_v13, %v2502_v13 }
 0xf11   :  { %v1153_v15 = vsel %vm124_vm0, %v1149_v9, 0.0 }
 0xf12   :  { %1154 = vadd.xlane.f32.xlu2 %v1153_v15  ;;  %1246 = vmax.xlane.f32.xlu0 %v2514_v19  ;;  %v1245_v57 = vpop.xlane.xlu1 %1244 }
 0xf1a   :  { %1248 = vmax.xlane.f32.xlu2 %v2512_v4  ;;  %1252 = vmax.xlane.f32.xlu0 %v2523_v14  ;;  %v1251_v62 = vpop.xlane.xlu1 %1250 }
 0xf22   :  { %1254 = vmax.xlane.f32.xlu2 %v2521_v21  ;;  %1258 = vmax.xlane.f32.xlu0 %v2532_v23  ;;  %v1257_v2 = vpop.xlane.xlu1 %1256 }
 0xf2a   :  { %1260 = vmax.xlane.f32.xlu2 %v2530_v22  ;;  %1264 = vmax.xlane.f32.xlu0 %v2541_v26  ;;  %v1263_v3 = vpop.xlane.xlu1 %1262 }
 0xf32   :  { %1266 = vmax.xlane.f32.xlu2 %v2539_v25  ;;  %1270 = vmax.xlane.f32.xlu0 %v2550_v29  ;;  %v1269_v10 = vpop.xlane.xlu1 %1268 }
 0xf3a   :  { %1272 = vmax.xlane.f32.xlu2 %v2548_v28 }
 0xf7d   :  { %v1152_v31 = vpop.xlane.xlu0 %1151 }
 0xf7e   :  { %v1156_v32 = vmul.f32 %v1152_v31, %v2344_v0 }
 0xf80   :  { %v1158_v34 = vadd.f32 1e-12, %v1156_v32 }
 0xf82   :  { %1940 = vrsqrt.f32 %v1158_v34  ;;  %vm1166_vm10 = vweird.f32 %v1158_v34 }
 0xf85   :  { %v1155_v35 = vpop.xlane.xlu2 %1154  ;;  %v1247_v63 = vpop.xlane.xlu0 %1246 }
 0xf86   :  { %v1157_v36 = vmul.f32 %v1155_v35, %v2344_v0  ;;  %v1182_v0 = vperm.slane %v2399_v59, 6  ;;  %v1275_v35 = vpop.xlane.xlu1 %1274 }
 0xf88   :  { %v1941_v37 = vpop.eup %1940  ;;  %v1159_v38 = vadd.f32 1e-12, %v1157_v36 }
 0xf89   :  { %v1161_v39 = vmul.f32 %v1941_v37, %v1158_v34  ;;  %vm1167_vm9 = vweird.f32 %v1941_v37 }
 0xf8a   :  { %1942 = vrsqrt.f32 %v1159_v38  ;;  %vm1168_vm11 = vmor %vm1166_vm10, %vm1167_vm9  ;;  %vm1176_vm13 = vweird.f32 %v1159_v38 }
 0xf8b   :  { %v1162_v40 = vmul.f32 %v1941_v37, %v1161_v39 }
 0xf8d   :  { %v1163_v41 = vmul.f32 0.5, %v1162_v40  ;;  %v1249_v5 = vpop.xlane.xlu2 %1248  ;;  %v1253_v6 = vpop.xlane.xlu0 %1252 }
 0xf8e   :  { %v1276_v59 = vmax.f32 %v1245_v57, %v1253_v6  ;;  %v1278_v12 = vmax.f32 %v1249_v5, %v1257_v2 }
 0xf8f   :  { %v1164_v42 = vsub.f32 1.5, %v1163_v41 }
 0xf90   :  { %v1943_v43 = vpop.eup %1942 }
 0xf91   :  { %v1165_v44 = vmul.f32 %v1941_v37, %v1164_v42  ;;  %v1171_v45 = vmul.f32 %v1943_v43, %v1159_v38  ;;  %vm1177_vm12 = vweird.f32 %v1943_v43 }
 0xf92   :  { %vm1178_vm14 = vmor %vm1176_vm13, %vm1177_vm12 }
 0xf93   :  { %v1172_v46 = vmul.f32 %v1943_v43, %v1171_v45  ;;  %v1169_v47 = vsel %vm1168_vm11, %v1941_v37, %v1165_v44 }
 0xf94   :  { %v1180_v50 = vmul.f32 %v1169_v47, %v2496_v7 }
 0xf95   :  { %v1173_v48 = vmul.f32 0.5, %v1172_v46  ;;  %v1255_v1 = vpop.xlane.xlu2 %1254  ;;  %v1259_v8 = vpop.xlane.xlu0 %1258 }
 0xf96   :  { %v1183_v54 = vmul.f32 %v1182_v0, %v1180_v50  ;;  %v1277_v15 = vmax.f32 %v1247_v63, %v1255_v1 }
 0xf97   :  { %v1174_v49 = vsub.f32 1.5, %v1173_v48 }
 0xf98   :  { %v1186_v58 = vadd.f32 %v1185_v53, %v1183_v54  ;;  %v1281_v33 = vmax.f32 %v1277_v15, %v1263_v3  ;;  %v1883_v15 = vld [vmem:[%s2839_s8] ss:$0 sm:$0xff] }
 0xf99   :  { %v1175_v51 = vmul.f32 %v1943_v43, %v1174_v49 }
 0xf9b   :  { %v1179_v52 = vsel %vm1178_vm14, %v1943_v43, %v1175_v51 }
 0xf9c   :  { %v1181_v55 = vmul.f32 %v1179_v52, %v2502_v13  ;;  %v1279_v13 = vmax.f32 %v1251_v62, %v1259_v8 }
 0xf9d   :  { %v1261_v7 = vpop.xlane.xlu2 %1260  ;;  %v1265_v9 = vpop.xlane.xlu0 %1264 }
 0xf9e   :  { %v1184_v56 = vmul.f32 %v1182_v0, %v1181_v55  ;;  %v1280_v30 = vmax.f32 %v1276_v59, %v1261_v7  ;;  %v1282_v31 = vmax.f32 %v1278_v12, %v1265_v9 }
 0xfa0   :  { %v1187_v60 = vadd.f32 %v1185_v53, %v1184_v56  ;;  %v1284_v34 = vmax.f32 %v1280_v30, %v1269_v10 }
 0xfa2   :  { %v1189_v61 = vpack.c.bf16 %v1187_v60, %v1186_v58 }
 0xfa4   :  { %1820 = vmatmul.msk.bf16.vlgmr.msra.gmra.mxu0 %vm124_vm0, %v1189_v61  ;;  %vm1350_vm0 = vcmask 1041409  }
 0xfa5   :  { %v1267_v11 = vpop.xlane.xlu2 %1266  ;;  %v1271_v38 = vpop.xlane.xlu0 %1270 }
 0xfa6   :  { %v1283_v32 = vmax.f32 %v1279_v13, %v1267_v11  ;;  %v1285_v40 = vmax.f32 %v1281_v33, %v1271_v38 }
 0xfa8   :  { %v1287_v37 = vmax.f32 %v1283_v32, %v1275_v35  ;;  %v1288_v42 = vmax.f32 %v1284_v34, %v1285_v40 }
 0xfad   :  { %v1273_v36 = vpop.xlane.xlu2 %1272 }
 0xfae   :  { %v1286_v39 = vmax.f32 %v1282_v31, %v1273_v36 }
 0xfb0   :  { %v1289_v41 = vmax.f32 %v1286_v39, %v1287_v37 }
 0xfb2   :  { %v1290_v43 = vmax.f32 %v1288_v42, %v1289_v41  ;;  %v1884_v41 = vld [vmem:[%s2839_s8 + $0x1] ss:$0 sm:$0xff] }
 0xfb4   :  { %v1291_v44 = vrot.slane %v1290_v43, 4 }
 0xfb6   :  { %v1292_v45 = vmax.f32 %v1290_v43, %v1291_v44 }
 0xfb8   :  { %v1293_v46 = vrot.slane %v1292_v45, 2 }
 0xfba   :  { %v1294_v47 = vmax.f32 %v1292_v45, %v1293_v46 }
 0xfbc   :  { %v1295_v48 = vrot.slane %v1294_v47, 1 }
 0xfbe   :  { %v2562_v49 = vmax.f32 %v1294_v47, %v1295_v48 }
 0xfc0   :  { %v1312_v0 = vsub.f32 %v2546_v27, %v2562_v49  ;;  %v1311_v50 = vsub.f32 %v2548_v28, %v2562_v49  ;;  %v1310_v53 = vsub.f32 %v2550_v29, %v2562_v49  ;;  %v1309_v55 = vsub.f32 %v2537_v24, %v2562_v49 }
 0xfc1   :  { %v1308_v58 = vsub.f32 %v2539_v25, %v2562_v49  ;;  %v1307_v28 = vsub.f32 %v2541_v26, %v2562_v49  ;;  %v1306_v29 = vsub.f32 %v2528_v16, %v2562_v49  ;;  %v1305_v57 = vsub.f32 %v2530_v22, %v2562_v49 }
 0xfc2   :  { %v1343_v51 = vmul.f32 1.442695, %v1312_v0  ;;  %v1341_v52 = vmul.f32 1.442695, %v1311_v50  ;;  %v1339_v54 = vmul.f32 1.442695, %v1310_v53  ;;  %v1304_v5 = vsub.f32 %v2532_v23, %v2562_v49 }
 0xfc3   :  { %v1337_v56 = vmul.f32 1.442695, %v1309_v55  ;;  %v1335_v27 = vmul.f32 1.442695, %v1308_v58  ;;  %v1333_v24 = vmul.f32 1.442695, %v1307_v28  ;;  %v1303_v2 = vsub.f32 %v2519_v20, %v2562_v49 }
 0xfc4   :  { %1944 = vpow2.f32 %v1343_v51  ;;  %v1331_v26 = vmul.f32 1.442695, %v1306_v29  ;;  %v1329_v62 = vmul.f32 1.442695, %v1305_v57  ;;  %v1327_v63 = vmul.f32 1.442695, %v1304_v5 }
 0xfc5   :  { %1946 = vpow2.f32 %v1341_v52  ;;  %v1302_v1 = vsub.f32 %v2521_v21, %v2562_v49  ;;  %v1301_v23 = vsub.f32 %v2523_v14, %v2562_v49  ;;  %v1300_v6 = vsub.f32 %v2510_v18, %v2562_v49 }
 0xfc6   :  { %1948 = vpow2.f32 %v1339_v54  ;;  %v1325_v7 = vmul.f32 1.442695, %v1303_v2  ;;  %v1299_v8 = vsub.f32 %v2512_v4, %v2562_v49  ;;  %v1298_v59 = vsub.f32 %v2514_v19, %v2562_v49 }
 0xfc7   :  { %1950 = vpow2.f32 %v1337_v56  ;;  %v1323_v20 = vmul.f32 1.442695, %v1302_v1  ;;  %v1321_v21 = vmul.f32 1.442695, %v1301_v23  ;;  %v1319_v18 = vmul.f32 1.442695, %v1300_v6 }
 0xfc8   :  { %1952 = vpow2.f32 %v1335_v27  ;;  %v1317_v4 = vmul.f32 1.442695, %v1299_v8  ;;  %v1297_v11 = vsub.f32 %v2507_v17, %v2562_v49  ;;  %v1315_v19 = vmul.f32 1.442695, %v1298_v59 }
 0xfc9   :  { %1954 = vpow2.f32 %v1333_v24  ;;  %v2175_v57 = vmov 0  }
 0xfca   :  { %v2576_v60 = vpop.eup %1944  ;;  %1956 = vpow2.f32 %v1331_v26  ;;  %v1313_v9 = vmul.f32 1.442695, %v1297_v11  ;;  %v2174_v26 = vmov 1  }
 0xfcb   :  { %v2578_v61 = vpop.eup %1946  ;;  %1361 = vmatpush.msra.mxu1 %v2576_v60  ;;  %1402 = vmatpush.msra.mxu2 %v2576_v60  ;;  %1958 = vpow2.f32 %v1329_v62 }
 0xfcc   :  { %1442 = vmatpush.msra.mxu3 %v2576_v60  ;;  %1482 = vmatpush.msrb.mxu0 %v2576_v60  ;;  %v2586_v25 = vpop.eup %1948  ;;  %1960 = vpow2.f32 %v1327_v63 }
 0xfcd   :  { %1362 = vmatpush.msra.mxu1 %v2578_v61  ;;  %1403 = vmatpush.msra.mxu2 %v2578_v61  ;;  %v2594_v16 = vpop.eup %1950  ;;  %1962 = vpow2.f32 %v1325_v7 }
 0xfce   :  { %1443 = vmatpush.msra.mxu3 %v2578_v61  ;;  %1483 = vmatpush.msrb.mxu0 %v2578_v61  ;;  %v2602_v22 = vpop.eup %1952  ;;  %1964 = vpow2.f32 %v1323_v20 }
 0xfcf   :  { %1363 = vmatpush.msra.mxu1 %v2586_v25  ;;  %1404 = vmatpush.msra.mxu2 %v2586_v25  ;;  %v2615_v3 = vpop.eup %1954  ;;  %1966 = vpow2.f32 %v1321_v21 }
 0xfd0   :  { %1444 = vmatpush.msra.mxu3 %v2586_v25  ;;  %1484 = vmatpush.msrb.mxu0 %v2586_v25  ;;  %v2623_v14 = vpop.eup %1956  ;;  %1968 = vpow2.f32 %v1319_v18 }
 0xfd1   :  { %1364 = vmatpush.msra.mxu1 %v2594_v16  ;;  %1405 = vmatpush.msra.mxu2 %v2594_v16  ;;  %v2631_v10 = vpop.eup %1958  ;;  %1970 = vpow2.f32 %v1317_v4 }
 0xfd2   :  { %1445 = vmatpush.msra.mxu3 %v2594_v16  ;;  %1485 = vmatpush.msrb.mxu0 %v2594_v16  ;;  %v2639_v12 = vpop.eup %1960  ;;  %1972 = vpow2.f32 %v1315_v19 }
 0xfd3   :  { %1365 = vmatpush.msra.mxu1 %v2602_v22  ;;  %1406 = vmatpush.msra.mxu2 %v2602_v22  ;;  %v2645_v13 = vpop.eup %1962  ;;  %1974 = vpow2.f32 %v1313_v9 }
 0xfd4   :  { %1446 = vmatpush.msra.mxu3 %v2602_v22  ;;  %1486 = vmatpush.msrb.mxu0 %v2602_v22  ;;  %v2649_v17 = vpop.eup %1964 }
 0xfd5   :  { %1366 = vmatpush.msra.mxu1 %v2615_v3  ;;  %1407 = vmatpush.msra.mxu2 %v2615_v3  ;;  %v2658_v30 = vpop.eup %1966 }
 0xfd6   :  { %1447 = vmatpush.msra.mxu3 %v2615_v3  ;;  %1487 = vmatpush.msrb.mxu0 %v2615_v3  ;;  %v2664_v31 = vpop.eup %1968 }
 0xfd7   :  { %1367 = vmatpush.msra.mxu1 %v2623_v14  ;;  %1408 = vmatpush.msra.mxu2 %v2623_v14  ;;  %v2672_v34 = vpop.eup %1970 }
 0xfd8   :  { %1448 = vmatpush.msra.mxu3 %v2623_v14  ;;  %1488 = vmatpush.msrb.mxu0 %v2623_v14  ;;  %v2679_v35 = vpop.eup %1972 }
 0xfd9   :  { %1368 = vmatpush.msra.mxu1 %v2631_v10  ;;  %1409 = vmatpush.msra.mxu2 %v2631_v10  ;;  %v2685_v36 = vpop.eup %1974 }
 0xfda   :  { %1449 = vmatpush.msra.mxu3 %v2631_v10  ;;  %1489 = vmatpush.msrb.mxu0 %v2631_v10 }
 0xfdb   :  { %1369 = vmatpush.msra.mxu1 %v2639_v12  ;;  %1410 = vmatpush.msra.mxu2 %v2639_v12 }
 0xfdc   :  { %1450 = vmatpush.msra.mxu3 %v2639_v12  ;;  %1490 = vmatpush.msrb.mxu0 %v2639_v12 }
 0xfdd   :  { %1370 = vmatpush.msra.mxu1 %v2645_v13  ;;  %1411 = vmatpush.msra.mxu2 %v2645_v13 }
 0xfde   :  { %1451 = vmatpush.msra.mxu3 %v2645_v13  ;;  %1491 = vmatpush.msrb.mxu0 %v2645_v13 }
 0xfdf   :  { %1371 = vmatpush.msra.mxu1 %v2649_v17  ;;  %1412 = vmatpush.msra.mxu2 %v2649_v17 }
 0xfe0   :  { %1452 = vmatpush.msra.mxu3 %v2649_v17  ;;  %1492 = vmatpush.msrb.mxu0 %v2649_v17 }
 0xfe1   :  { %1372 = vmatpush.msra.mxu1 %v2658_v30  ;;  %1413 = vmatpush.msra.mxu2 %v2658_v30 }
 0xfe2   :  { %1453 = vmatpush.msra.mxu3 %v2658_v30  ;;  %1493 = vmatpush.msrb.mxu0 %v2658_v30 }
 0xfe3   :  { %1373 = vmatpush.msra.mxu1 %v2664_v31  ;;  %1414 = vmatpush.msra.mxu2 %v2664_v31 }
 0xfe4   :  { %1454 = vmatpush.msra.mxu3 %v2664_v31  ;;  %1494 = vmatpush.msrb.mxu0 %v2664_v31 }
 0xfe5   :  { %1374 = vmatpush.msra.mxu1 %v2672_v34  ;;  %1415 = vmatpush.msra.mxu2 %v2672_v34 }
 0xfe6   :  { %1455 = vmatpush.msra.mxu3 %v2672_v34  ;;  %1495 = vmatpush.msrb.mxu0 %v2672_v34 }
 0xfe7   :  { %1375 = vmatpush.msra.mxu1 %v2679_v35  ;;  %1416 = vmatpush.msra.mxu2 %v2679_v35 }
 0xfe8   :  { %1456 = vmatpush.msra.mxu3 %v2679_v35  ;;  %1496 = vmatpush.msrb.mxu0 %v2679_v35 }
 0xfe9   :  { %1376 = vmatpush.msra.mxu1 %v2685_v36  ;;  %1417 = vmatpush.msra.mxu2 %v2685_v36 }
 0xfea   :  { %1457 = vmatpush.msra.mxu3 %v2685_v36  ;;  %1497 = vmatpush.msrb.mxu0 %v2685_v36 }
 0xfeb   :  { %1522 = vmatpush.msrb.mxu1 %v2576_v60  ;;  %1562 = vmatpush.msrb.mxu2 %v2576_v60 }
 0xfec   :  { %1602 = vmatpush.msrb.mxu3 %v2576_v60  ;;  %1875 = vset.pattern.permute.xlu2 %v2174_v26 }
 0xfed   :  { %1523 = vmatpush.msrb.mxu1 %v2578_v61  ;;  %1563 = vmatpush.msrb.mxu2 %v2578_v61 }
 0xfee   :  { %1603 = vmatpush.msrb.mxu3 %v2578_v61 }
 0xfef   :  { %1524 = vmatpush.msrb.mxu1 %v2586_v25  ;;  %1564 = vmatpush.msrb.mxu2 %v2586_v25 }
 0xff0   :  { %1604 = vmatpush.msrb.mxu3 %v2586_v25  ;;  %v1345_v25 = vld [vmem:[%s2840_s9] sm:$0x3] }
 0xff1   :  { %1525 = vmatpush.msrb.mxu1 %v2594_v16  ;;  %1565 = vmatpush.msrb.mxu2 %v2594_v16  ;;  %vm1389_vm4 = vcmp.gt.f32.partialorder %v1345_v25, 0.0  ;;  %v2179_v25 = vmov 5  }
 0xff2   :  { %1605 = vmatpush.msrb.mxu3 %v2594_v16  ;;  %v2786_v16 = vsel %vm1389_vm4, 1, %v2175_v57 }
 0xff3   :  { %1526 = vmatpush.msrb.mxu1 %v2602_v22  ;;  %1566 = vmatpush.msrb.mxu2 %v2602_v22 }
 0xff4   :  { %1606 = vmatpush.msrb.mxu3 %v2602_v22  ;;  %1392 = vperm.xlu2 %1875, %v2786_v16  }
 0xff5   :  { %1527 = vmatpush.msrb.mxu1 %v2615_v3  ;;  %1567 = vmatpush.msrb.mxu2 %v2615_v3 }
 0xff6   :  { %1607 = vmatpush.msrb.mxu3 %v2615_v3 }
 0xff7   :  { %1528 = vmatpush.msrb.mxu1 %v2623_v14  ;;  %1568 = vmatpush.msrb.mxu2 %v2623_v14 }
 0xff8   :  { %1608 = vmatpush.msrb.mxu3 %v2623_v14  ;;  %v2176_v14 = vmov 2  }
 0xff9   :  { %1529 = vmatpush.msrb.mxu1 %v2631_v10  ;;  %1569 = vmatpush.msrb.mxu2 %v2631_v10 }
 0xffa   :  { %1609 = vmatpush.msrb.mxu3 %v2631_v10  ;;  %1876 = vset.pattern.permute.xlu0 %v2176_v14 }
 0xffb   :  { %1530 = vmatpush.msrb.mxu1 %v2639_v12  ;;  %1570 = vmatpush.msrb.mxu2 %v2639_v12 }
 0xffc   :  { %1610 = vmatpush.msrb.mxu3 %v2639_v12 }
 0xffd   :  { %1531 = vmatpush.msrb.mxu1 %v2645_v13  ;;  %1571 = vmatpush.msrb.mxu2 %v2645_v13 }
 0xffe   :  { %1611 = vmatpush.msrb.mxu3 %v2645_v13 }
 0xfff   :  { %1532 = vmatpush.msrb.mxu1 %v2649_v17  ;;  %1572 = vmatpush.msrb.mxu2 %v2649_v17 }
0x1000   :  { %1612 = vmatpush.msrb.mxu3 %v2649_v17 }
0x1001   :  { %1533 = vmatpush.msrb.mxu1 %v2658_v30  ;;  %1573 = vmatpush.msrb.mxu2 %v2658_v30 }
0x1002   :  { %1613 = vmatpush.msrb.mxu3 %v2658_v30 }
0x1003   :  { %1534 = vmatpush.msrb.mxu1 %v2664_v31  ;;  %1574 = vmatpush.msrb.mxu2 %v2664_v31 }
0x1004   :  { %1614 = vmatpush.msrb.mxu3 %v2664_v31 }
0x1005   :  { %1535 = vmatpush.msrb.mxu1 %v2672_v34  ;;  %1575 = vmatpush.msrb.mxu2 %v2672_v34 }
0x1006   :  { %1615 = vmatpush.msrb.mxu3 %v2672_v34 }
0x1007   :  { %1536 = vmatpush.msrb.mxu1 %v2679_v35  ;;  %1576 = vmatpush.msrb.mxu2 %v2679_v35 }
0x1008   :  { %1616 = vmatpush.msrb.mxu3 %v2679_v35 }
0x1009   :  { %1537 = vmatpush.msrb.mxu1 %v2685_v36  ;;  %1577 = vmatpush.msrb.mxu2 %v2685_v36 }
0x100a   :  { %1617 = vmatpush.msrb.mxu3 %v2685_v36 }
0x1021   :  { %v1219_v32 = vpop.f32.mrf.mxu0 }
0x1022   :  { %v2668_v33 = vadd.f32 %v1883_v15, %v1219_v32  ;;  %v2177_v32 = vmov 3  }
0x1023   :  { %1877 = vset.pattern.permute.xlu1 %v2177_v32 }
0x1024   :  { %1224 = vst [vmem:[#allocation10] sm:$0xff] %v2668_v33  ;;  %v1385_v39 = vrot.slane %v2668_v33, 1  ;;  %v1426_v40 = vrot.slane %v2668_v33, 2  ;;  %v1466_v42 = vrot.slane %v2668_v33, 3  ;;  %v1506_v43 = vrot.slane %v2668_v33, 4 }
0x1025   :  { %v1546_v44 = vrot.slane %v2668_v33, 5  ;;  %v1586_v45 = vrot.slane %v2668_v33, 6  ;;  %v1626_v58 = vrot.slane %v2668_v33, 7 }
0x1029   :  { %v1221_v37 = vpop.f32.mrf.mxu0 }
0x102a   :  { %v1222_v38 = vadd.f32 %v1883_v15, %v1221_v37 }
0x102c   :  { %1225 = vst [vmem:[#allocation10 + $0x8] sm:$0xff] %v1222_v38  ;;  %v1349_v46 = vrot.slane %v1222_v38, 7  ;;  %v2709_v47 = vsel %vm1350_vm0, %v1222_v38, %v1385_v39  ;;  %v1427_v48 = vrot.slane %v1222_v38, 1  ;;  %v1467_v0 = vrot.slane %v1222_v38, 2 }
0x102d   :  { %v1507_v50 = vrot.slane %v1222_v38, 3  ;;  %v1547_v51 = vrot.slane %v1222_v38, 4  ;;  %v1587_v52 = vrot.slane %v1222_v38, 5  ;;  %v1627_v53 = vrot.slane %v1222_v38, 6 }
0x102e   :  { %v1351_v54 = vsel %vm1350_vm0, %v1349_v46, %v2668_v33  ;;  %v2718_v55 = vsel %vm1350_vm0, %v1427_v48, %v1426_v40  ;;  %v2721_v56 = vsel %vm1350_vm0, %v1467_v0, %v1466_v42  ;;  %v2178_v46 = vmov 4  }
0x102f   :  { %v2724_v27 = vadd.f32 %v1884_v41, %v1351_v54  ;;  %v2729_v28 = vsel %vm1350_vm0, %v1507_v50, %v1506_v43  ;;  %v2732_v60 = vsel %vm1350_vm0, %v1547_v51, %v1546_v44  ;;  %v2737_v61 = vsel %vm1350_vm0, %v1587_v52, %v1586_v45 }
0x1030   :  { %v2740_v24 = vsel %vm1350_vm0, %v1627_v53, %v1626_v58 }
0x1031   :  { %v1355_v29 = vsel %vm1354_vm15, %v2724_v27, -inf }
0x1032   :  { %1356 = vmax.xlane.f32.xlu0 %v1355_v29 }
0x1046   :  { %1432 = vperm.xlu0 %1876, %v2786_v16  }
0x104e   :  { %v1393_v3 = vpop.permute.xlu2 %1392  ;;  %1878 = vset.pattern.permute.xlu0 %v2178_v46 }
0x104f   :  { %vm1394_vm5 = vcmp.eq.s32.totalorder %v1393_v3, 1  ;;  %1512 = vperm.xlu0 %1878, %v2786_v16  }
0x1057   :  { %1879 = vset.pattern.permute.xlu0 %v2179_v25 }
0x1058   :  { %1552 = vperm.xlu0 %1879, %v2786_v16  }
0x10a5   :  { %v1357_v62 = vpop.xlane.xlu0 %1356 }
0x10a6   :  { %v1358_v5 = vsub.f32 %v2724_v27, %v1357_v62  ;;  %v1381_v23 = vadd.f32 %v1357_v62, %v2562_v49 }
0x10a8   :  { %v1359_v22 = vmul.f32 1.442695, %v1358_v5 }
0x10aa   :  { %1976 = vpow2.f32 %v1359_v22 }
0x10b0   :  { %v1977_v63 = vpop.eup %1976 }
0x10b1   :  { %1377 = vmatmul.f32.vlgmr.msra.gmra.mxu1 %v1977_v63 }
0x10b8   :  { %v1433_v17 = vpop.permute.xlu0 %1432 }
0x10b9   :  { %vm1434_vm1 = vcmp.eq.s32.totalorder %v1433_v17, 1 }
0x112e   :  { %v1378_v2 = vpop.f32.mrf.mxu1 }
0x112f   :  { %1978 = vlog2.f32 %v1378_v2 }
0x1135   :  { %v1979_v1 = vpop.eup %1978 }
0x1136   :  { %v1383_v6 = vmul.f32 0.6931472, %v1979_v1 }
0x1138   :  { %v1384_v7 = vadd.f32 %v1383_v6, %v1381_v23 }
0x113a   :  { %v1388_v20 = vadd.f32 %v2709_v47, %v1384_v7 }
0x113c   :  { %v1395_v21 = vsel %vm1394_vm5, %v1388_v20, %v2724_v27  ;;  %v2180_v20 = vmov 6  }
0x113d   :  { %v1396_v8 = vsel %vm1354_vm15, %v1395_v21, -inf  ;;  %1880 = vset.pattern.permute.xlu2 %v2180_v20 }
0x113e   :  { %1397 = vmax.xlane.f32.xlu1 %v1396_v8 }
0x11b1   :  { %v1398_v18 = vpop.xlane.xlu1 %1397 }
0x11b2   :  { %v1399_v59 = vsub.f32 %v1395_v21, %v1398_v18  ;;  %v1422_v19 = vadd.f32 %v1398_v18, %v2562_v49 }
0x11b4   :  { %v1400_v10 = vmul.f32 1.442695, %v1399_v59 }
0x11b6   :  { %1980 = vpow2.f32 %v1400_v10 }
0x11bc   :  { %v1981_v4 = vpop.eup %1980 }
0x11bd   :  { %1418 = vmatmul.f32.vlgmr.msra.gmra.mxu2 %v1981_v4 }
0x1240   :  { %v1419_v11 = vpop.f32.mrf.mxu2 }
0x1241   :  { %1982 = vlog2.f32 %v1419_v11 }
0x1247   :  { %v1983_v12 = vpop.eup %1982 }
0x1248   :  { %v1424_v13 = vmul.f32 0.6931472, %v1983_v12 }
0x124a   :  { %v1425_v9 = vadd.f32 %v1424_v13, %v1422_v19 }
0x124c   :  { %v1430_v15 = vadd.f32 %v2718_v55, %v1425_v9  ;;  %v1513_v55 = vpop.permute.xlu0 %1512  ;;  %v2181_v9 = vmov 7  }
0x124d   :  { %vm1514_vm3 = vcmp.eq.s32.totalorder %v1513_v55, 1  ;;  %1882 = vset.pattern.permute.xlu0 %v2181_v9 }
0x124e   :  { %v1435_v30 = vsel %vm1434_vm1, %v1430_v15, %v1395_v21 }
0x124f   :  { %v1436_v31 = vsel %vm1354_vm15, %v1435_v30, -inf }
0x1250   :  { %1437 = vmax.xlane.f32.xlu1 %v1436_v31 }
0x1254   :  { %v1553_v1 = vpop.permute.xlu0 %1552 }
0x1255   :  { %vm1554_vm6 = vcmp.eq.s32.totalorder %v1553_v1, 1 }
0x1269   :  { %1472 = vperm.xlu1 %1877, %v2786_v16  }
0x1271   :  { %1881 = vset.pattern.permute.xlu1 %v2181_v9 }
0x12c3   :  { %v1438_v33 = vpop.xlane.xlu1 %1437 }
0x12c4   :  { %v1439_v34 = vsub.f32 %v1435_v30, %v1438_v33  ;;  %v1462_v39 = vadd.f32 %v1438_v33, %v2562_v49 }
0x12c6   :  { %v1440_v35 = vmul.f32 1.442695, %v1439_v34 }
0x12c8   :  { %1984 = vpow2.f32 %v1440_v35 }
0x12ce   :  { %v1985_v36 = vpop.eup %1984 }
0x12cf   :  { %1458 = vmatmul.f32.vlgmr.msra.gmra.mxu3 %v1985_v36 }
0x12db   :  { %v1473_v41 = vpop.permute.xlu1 %1472 }
0x12dc   :  { %vm1474_vm2 = vcmp.eq.s32.totalorder %v1473_v41, 1 }
0x1352   :  { %v1459_v37 = vpop.f32.mrf.mxu3 }
0x1353   :  { %1986 = vlog2.f32 %v1459_v37 }
0x1359   :  { %v1987_v38 = vpop.eup %1986 }
0x135a   :  { %v1464_v40 = vmul.f32 0.6931472, %v1987_v38  ;;  %v1885_v38 = vld [vmem:[%s2839_s8 + $0x2] ss:$0 sm:$0xff]  ;;  %s2182_s8 = smov [#allocation10]  }
0x135b   :  { %s1655_s16 = sshll.u32 %s2182_s8, 4  ;;  %s1656_s16 = int_to_ptr.vmem [resolvable:$true] %s1655_s16 }
0x135c   :  { %v1465_v42 = vadd.f32 %v1464_v40, %v1462_v39  ;;  %1663 = dma.vmem_to_hbm [thread:$0]  %s1656_s16, 256, %s1658_s1, [#allocation4], %s2163_s25, %s2163_s25, %s2164_s26  }
0x135e   :  { %v1470_v43 = vadd.f32 %v2721_v56, %v1465_v42 }
0x1360   :  { %v1475_v44 = vsel %vm1474_vm2, %v1470_v43, %v1435_v30 }
0x1361   :  { %v1476_v45 = vsel %vm1354_vm15, %v1475_v44, -inf }
0x1362   :  { %1477 = vmax.xlane.f32.xlu2 %v1476_v45 }
0x13d5   :  { %v1478_v47 = vpop.xlane.xlu2 %1477 }
0x13d6   :  { %v1479_v48 = vsub.f32 %v1475_v44, %v1478_v47  ;;  %v1502_v53 = vadd.f32 %v1478_v47, %v2562_v49 }
0x13d8   :  { %v1480_v0 = vmul.f32 1.442695, %v1479_v48 }
0x13da   :  { %1988 = vpow2.f32 %v1480_v0 }
0x13e0   :  { %v1989_v50 = vpop.eup %1988 }
0x13e1   :  { %1498 = vmatmul.f32.vlgmr.msrb.gmra.mxu0 %v1989_v50 }
0x145e   :  { %v1499_v51 = vpop.f32.mrf.mxu0 }
0x145f   :  { %1990 = vlog2.f32 %v1499_v51 }
0x1465   :  { %v1991_v52 = vpop.eup %1990 }
0x1466   :  { %v1504_v54 = vmul.f32 0.6931472, %v1991_v52 }
0x1468   :  { %v1505_v56 = vadd.f32 %v1504_v54, %v1502_v53 }
0x146a   :  { %v1510_v58 = vadd.f32 %v2729_v28, %v1505_v56 }
0x146c   :  { %v1515_v27 = vsel %vm1514_vm3, %v1510_v58, %v1475_v44 }
0x146d   :  { %v1516_v29 = vsel %vm1354_vm15, %v1515_v27, -inf }
0x146e   :  { %1517 = vmax.xlane.f32.xlu1 %v1516_v29 }
0x1487   :  { %1632 = vperm.xlu1 %1881, %v2786_v16  }
0x14e1   :  { %v1518_v26 = vpop.xlane.xlu1 %1517 }
0x14e2   :  { %v1519_v57 = vsub.f32 %v1515_v27, %v1518_v26  ;;  %v1542_v2 = vadd.f32 %v1518_v26, %v2562_v49 }
0x14e4   :  { %v1520_v62 = vmul.f32 1.442695, %v1519_v57 }
0x14e6   :  { %1992 = vpow2.f32 %v1520_v62 }
0x14ec   :  { %v1993_v5 = vpop.eup %1992 }
0x14ed   :  { %1538 = vmatmul.f32.vlgmr.msrb.gmra.mxu1 %v1993_v5 }
0x14f9   :  { %v1633_v36 = vpop.permute.xlu1 %1632 }
0x14fa   :  { %vm1634_vm8 = vcmp.eq.s32.totalorder %v1633_v36, 1 }
0x156a   :  { %v1539_v22 = vpop.f32.mrf.mxu1 }
0x156b   :  { %1994 = vlog2.f32 %v1539_v22 }
0x1571   :  { %v1995_v63 = vpop.eup %1994 }
0x1572   :  { %v1544_v28 = vmul.f32 0.6931472, %v1995_v63 }
0x1574   :  { %v1545_v23 = vadd.f32 %v1544_v28, %v1542_v2 }
0x1576   :  { %v1550_v6 = vadd.f32 %v2732_v60, %v1545_v23 }
0x1578   :  { %v1555_v3 = vsel %vm1554_vm6, %v1550_v6, %v1515_v27 }
0x1579   :  { %v1556_v7 = vsel %vm1354_vm15, %v1555_v3, -inf }
0x157a   :  { %1557 = vmax.xlane.f32.xlu2 %v1556_v7 }
0x1592   :  { %1592 = vperm.xlu2 %1880, %v2786_v16  }
0x15ed   :  { %v1558_v21 = vpop.xlane.xlu2 %1557 }
0x15ee   :  { %v1559_v8 = vsub.f32 %v1555_v3, %v1558_v21  ;;  %v1582_v4 = vadd.f32 %v1558_v21, %v2562_v49 }
0x15f0   :  { %v1560_v14 = vmul.f32 1.442695, %v1559_v8 }
0x15f2   :  { %1996 = vpow2.f32 %v1560_v14 }
0x15f5   :  { %v1593_v11 = vpop.permute.xlu2 %1592 }
0x15f6   :  { %vm1594_vm7 = vcmp.eq.s32.totalorder %v1593_v11, 1 }
0x15f8   :  { %v1997_v18 = vpop.eup %1996 }
0x15f9   :  { %1578 = vmatmul.f32.vlgmr.msrb.gmra.mxu2 %v1997_v18 }
0x167c   :  { %v1579_v59 = vpop.f32.mrf.mxu2 }
0x167d   :  { %1998 = vlog2.f32 %v1579_v59 }
0x1683   :  { %v1999_v10 = vpop.eup %1998 }
0x1684   :  { %v1584_v60 = vmul.f32 0.6931472, %v1999_v10 }
0x1686   :  { %v1585_v12 = vadd.f32 %v1584_v60, %v1582_v4 }
0x1688   :  { %v1590_v19 = vadd.f32 %v2737_v61, %v1585_v12 }
0x168a   :  { %v1595_v13 = vsel %vm1594_vm7, %v1590_v19, %v1555_v3 }
0x168b   :  { %v1596_v17 = vsel %vm1354_vm15, %v1595_v13, -inf }
0x168c   :  { %1597 = vmax.xlane.f32.xlu0 %v1596_v17 }
0x16ff   :  { %v1598_v15 = vpop.xlane.xlu0 %1597 }
0x1700   :  { %v1599_v30 = vsub.f32 %v1595_v13, %v1598_v15  ;;  %v1622_v61 = vadd.f32 %v1598_v15, %v2562_v49 }
0x1702   :  { %v1600_v31 = vmul.f32 1.442695, %v1599_v30 }
0x1704   :  { %2000 = vpow2.f32 %v1600_v31 }
0x170a   :  { %v2001_v32 = vpop.eup %2000 }
0x170b   :  { %1618 = vmatmul.f32.vlgmr.msrb.gmra.mxu3 %v2001_v32 }
0x178e   :  { %v1619_v33 = vpop.f32.mrf.mxu3 }
0x178f   :  { %2002 = vlog2.f32 %v1619_v33 }
0x1795   :  { %v2003_v34 = vpop.eup %2002 }
0x1796   :  { %v1624_v35 = vmul.f32 0.6931472, %v2003_v34 }
0x1798   :  { %v1625_v37 = vadd.f32 %v1624_v35, %v1622_v61 }
0x179a   :  { %v1630_v16 = vadd.f32 %v2740_v24, %v1625_v37 }
0x179c   :  { %v1635_v39 = vsel %vm1634_vm8, %v1630_v16, %v1595_v13 }
0x179d   :  { %v1637_v40 = vadd.f32 %v1885_v38, %v1635_v39 }
0x179f   :  { %v1638_v41 = vsel %vm1354_vm15, %v1637_v40, -inf }
0x17a0   :  { %1639 = vmax.xlane.f32.xlu2 %v1638_v41 }
0x1813   :  { %v1640_v42 = vpop.xlane.xlu2 %1639 }
0x1814   :  { %v1641_v43 = vsub.f32 %v1637_v40, %v1640_v42 }
0x1816   :  { %v1642_v44 = vmul.f32 1.442695, %v1641_v43 }
0x1818   :  { %2004 = vpow2.f32 %v1642_v44 }
0x181e   :  { %v2005_v49 = vpop.eup %2004 }
0x181f   :  { %v1644_v45 = vsel %vm1354_vm15, %v2005_v49, 0.0 }
0x1820   :  { %1645 = vadd.xlane.f32.xlu1 %v1644_v45 }
0x1893   :  { %v1646_v24 = vpop.xlane.xlu1 %1645 }
0x1894   :  { %2006 = vlog2.f32 %v1646_v24 }
0x189a   :  { %v2007_v46 = vpop.eup %2006 }
0x189b   :  { %v1648_v47 = vmul.f32 0.6931472, %v2007_v46 }
0x189d   :  { %v1649_v48 = vadd.f32 %v1648_v47, %v1640_v42 }
0x189f   :  { %1650 = vst [vmem:[#allocation11] sm:$0x3] %v1649_v48 }
0x18a0   :  { %1674 = dma.vmem_to_hbm [thread:$0]  %s1670_s23, 32, %s1672_s30, [#allocation12]  }
0x18a1   :  { %2158 = dma.done.wait [#allocation4], 256  }
0x18a2   :  { %2159 = vsyncadd [#allocation4], 4294967040 }
0x18a3   :  { %2160 = dma.done.wait [#allocation12], 32  }
0x18a4   :  { %2161 = vsyncadd [#allocation12], 4294967264 }
0x18a5   :  { %1683 = vsyncpa [#allocation3], 1 }
0x18a6   :  { %1684 = vsyncpa [#allocation6], 1 }
0x18a7   :  { %1685 = vsyncpa [#allocation9], 1 }
0x18a8   :  { %1686 = vsyncpa [#allocation4], 1 }
0x18a9   :  { %1687 = vsyncpa [#allocation12], 1 }

</bundles_post_ra>
